<compile_context>
chip_gen: v7x
topology: tpu7x:2x2x1
jax: 0.10.0
libtpu: 0.0.40
codegen_flags: <defaults>
</compile_context>

<pallas_src>
import functools

import jax
import jax.numpy as jnp
from jax.experimental import pallas as pl
from jax.experimental.pallas import tpu as pltpu


_PAD = 256  # pad every dim to a multiple of 256 (feeds the 256x256 MXU on v6e/v7x)


def _round_up(v, m):
    return ((v + m - 1) // m) * m


def _tile(dim, target=512):
    # dim is a multiple of 256; prefer 512-long tiles (better HBM DMA efficiency),
    # otherwise 256.
    return target if dim % target == 0 else 256


def _vmem_limit_bytes():
    """Scoped-VMEM limit ≈ 75% of physical VMEM (96 MiB v5e/v6e, 48 MiB v7x)."""
    try:
        cap = pltpu.get_tpu_info().vmem_capacity_bytes
    except Exception:
        cap = 64 * 1024 * 1024  # conservative default: v7x has 64 MiB per TensorCore
    return max(32 * 1024 * 1024, int(cap) * 3 // 4)


def _masked_log_softmax(h, valid_cols):
    """log_softmax over the first `valid_cols` lanes; padded lanes ignored."""
    hp = h.shape[-1]
    if valid_cols < hp:
        col = jax.lax.broadcasted_iota(jnp.int32, h.shape, h.ndim - 1)
        valid = col < valid_cols
        masked = jnp.where(valid, h, -jnp.inf)
        m = jnp.max(masked, axis=-1, keepdims=True)
        shifted = h - m
        e = jnp.where(valid, jnp.exp(shifted), 0.0)
    else:
        m = jnp.max(h, axis=-1, keepdims=True)
        shifted = h - m
        e = jnp.exp(shifted)
    lse = jnp.log(jnp.sum(e, axis=-1, keepdims=True))
    return shifted - lse


# ---------------------------------------------------------------------------
# Phase A: support = X @ W   (tiled matmul, f32 accumulate, cast output)
# ---------------------------------------------------------------------------
def _matmul_kernel(a_ref, b_ref, o_ref, acc_ref):
    k = pl.program_id(2)

    @pl.when(k == 0)
    def _():
        acc_ref[...] = jnp.zeros_like(acc_ref)

    acc_ref[...] += jnp.dot(a_ref[...], b_ref[...],
                            preferred_element_type=jnp.float32)

    @pl.when(k == pl.num_programs(2) - 1)
    def _():
        o_ref[...] = acc_ref[...].astype(o_ref.dtype)


def _matmul(a, b, *, out_dtype, tm, tn, tk, vmem_limit):
    m, kdim = a.shape
    _, n = b.shape
    grid = (m // tm, n // tn, kdim // tk)
    return pl.pallas_call(
        _matmul_kernel,
        out_shape=jax.ShapeDtypeStruct((m, n), out_dtype),
        grid_spec=pltpu.PrefetchScalarGridSpec(
            num_scalar_prefetch=0,
            grid=grid,
            in_specs=[
                pl.BlockSpec((tm, tk), lambda i, j, k: (i, k)),
                pl.BlockSpec((tk, tn), lambda i, j, k: (k, j)),
            ],
            out_specs=pl.BlockSpec((tm, tn), lambda i, j, k: (i, j)),
            scratch_shapes=[pltpu.VMEM((tm, tn), jnp.float32)],
        ),
        compiler_params=pltpu.CompilerParams(
            dimension_semantics=("parallel", "parallel", "arbitrary"),
            vmem_limit_bytes=vmem_limit,
        ),
    )(a, b)


# ---------------------------------------------------------------------------
# Phase B: H = epilogue(adj @ support + b)
#   - `resident=True`: support slab lives whole in VMEM (loaded once), sliced
#     per k-step in-kernel.  `resident=False`: support streamed (Buffered(3)).
#   epilogue = bias + ReLU (+ masked log_softmax for the final layer)
# ---------------------------------------------------------------------------
def _make_agg_kernel(*, tk, resident, apply_log_softmax, valid_cols):
    def kernel(adj_ref, s_ref, b_ref, o_ref, acc_ref):
        k = pl.program_id(1)

        @pl.when(k == 0)
        def _():
            acc_ref[...] = jnp.zeros_like(acc_ref)

        if resident:
            start = pl.multiple_of(k * tk, tk)
            s_blk = s_ref[pl.ds(start, tk), :]
        else:
            s_blk = s_ref[...]
        acc_ref[...] += jnp.dot(adj_ref[...], s_blk,
                                preferred_element_type=jnp.float32)

        @pl.when(k == pl.num_programs(1) - 1)
        def _():
            h = jnp.maximum(acc_ref[...] + b_ref[...], 0.0)   # bias + ReLU (f32)
            if apply_log_softmax:
                h = _masked_log_softmax(h, valid_cols)
            o_ref[...] = h.astype(o_ref.dtype)

    return kernel


def _aggregate(adj, support, bias, *, out_dtype, tm, tk, apply_log_softmax,
               valid_cols, resident, vmem_limit):
    m, kdim = adj.shape
    _, hwidth = support.shape
    grid = (m // tm, kdim // tk)

    kernel = _make_agg_kernel(tk=tk, resident=resident,
                              apply_log_softmax=apply_log_softmax,
                              valid_cols=valid_cols)
    if resident:
        # Full-array resident block (loaded once; constant index_map).
        s_spec = pl.BlockSpec((kdim, hwidth), lambda i, k: (0, 0))
    else:
        # Streaming fallback (huge graphs / v7x VMEM pressure): deepen buffering.
        s_spec = pl.BlockSpec((tk, hwidth), lambda i, k: (k, 0),
                              pipeline_mode=pl.Buffered(3))

    return pl.pallas_call(
        kernel,
        out_shape=jax.ShapeDtypeStruct((m, hwidth), out_dtype),
        grid_spec=pltpu.PrefetchScalarGridSpec(
            num_scalar_prefetch=0,
            grid=grid,
            in_specs=[
                pl.BlockSpec((tm, tk), lambda i, k: (i, k)),      # adj row tile (streamed)
                s_spec,                                           # support slab
                pl.BlockSpec((1, hwidth), lambda i, k: (0, 0)),   # bias (resident)
            ],
            out_specs=pl.BlockSpec((tm, hwidth), lambda i, k: (i, 0)),
            scratch_shapes=[pltpu.VMEM((tm, hwidth), jnp.float32)],
        ),
        compiler_params=pltpu.CompilerParams(
            dimension_semantics=("parallel", "arbitrary"),
            vmem_limit_bytes=vmem_limit,
        ),
    )(adj, support, bias)


# ---------------------------------------------------------------------------
# Fused layer 2: out = log_softmax(relu(adj @ (H1 @ W2) + b2))
#   H1 and W2 stay VMEM-resident; the support tile is recomputed on the fly
#   (recompute factor h_p/tm, hidden under the adj HBM stream).
# ---------------------------------------------------------------------------
def _make_fused_layer2_kernel(*, tk, apply_log_softmax, valid_cols):
    def kernel(adj_ref, h_ref, w_ref, b_ref, o_ref, acc_ref):
        k = pl.program_id(1)

        @pl.when(k == 0)
        def _():
            acc_ref[...] = jnp.zeros_like(acc_ref)

        start = pl.multiple_of(k * tk, tk)
        h_blk = h_ref[pl.ds(start, tk), :]                       # (tk, h_p) bf16
        s_blk = jnp.dot(h_blk, w_ref[...],
                        preferred_element_type=jnp.float32).astype(jnp.bfloat16)
        acc_ref[...] += jnp.dot(adj_ref[...], s_blk,
                                preferred_element_type=jnp.float32)

        @pl.when(k == pl.num_programs(1) - 1)
        def _():
            h = jnp.maximum(acc_ref[...] + b_ref[...], 0.0)
            if apply_log_softmax:
                h = _masked_log_softmax(h, valid_cols)
            o_ref[...] = h.astype(o_ref.dtype)

    return kernel


def _aggregate_fused(adj, h, w, bias, *, out_dtype, tm, tk, apply_log_softmax,
                     valid_cols, vmem_limit):
    m, kdim = adj.shape
    _, hwidth = w.shape
    grid = (m // tm, kdim // tk)
    kernel = _make_fused_layer2_kernel(tk=tk, apply_log_softmax=apply_log_softmax,
                                       valid_cols=valid_cols)
    return pl.pallas_call(
        kernel,
        out_shape=jax.ShapeDtypeStruct((m, hwidth), out_dtype),
        grid_spec=pltpu.PrefetchScalarGridSpec(
            num_scalar_prefetch=0,
            grid=grid,
            in_specs=[
                pl.BlockSpec((tm, tk), lambda i, k: (i, k)),              # adj (streamed)
                pl.BlockSpec((kdim, h.shape[1]), lambda i, k: (0, 0)),    # H1 (resident)
                pl.BlockSpec((w.shape[0], hwidth), lambda i, k: (0, 0)),  # W2 (resident)
                pl.BlockSpec((1, hwidth), lambda i, k: (0, 0)),           # bias
            ],
            out_specs=pl.BlockSpec((tm, hwidth), lambda i, k: (i, 0)),
            scratch_shapes=[pltpu.VMEM((tm, hwidth), jnp.float32)],
        ),
        compiler_params=pltpu.CompilerParams(
            dimension_semantics=("parallel", "arbitrary"),
            vmem_limit_bytes=vmem_limit,
        ),
    )(adj, h, w, bias)


# ---------------------------------------------------------------------------
# Whole-network fused kernel for small graphs (everything VMEM-resident,
# a single pallas_call, no grid).
# ---------------------------------------------------------------------------
def _make_fused_small_kernel(valid_cols):
    def kernel(x_ref, adj_ref, w1_ref, b1_ref, w2_ref, b2_ref, o_ref):
        bf16 = jnp.bfloat16
        adj = adj_ref[...]
        s1 = jnp.dot(x_ref[...], w1_ref[...],
                     preferred_element_type=jnp.float32).astype(bf16)
        h1 = jnp.maximum(jnp.dot(adj, s1, preferred_element_type=jnp.float32)
                         + b1_ref[...], 0.0).astype(bf16)
        # eval-mode dropout (training=False) is the identity.
        s2 = jnp.dot(h1, w2_ref[...],
                     preferred_element_type=jnp.float32).astype(bf16)
        h2 = jnp.maximum(jnp.dot(adj, s2, preferred_element_type=jnp.float32)
                         + b2_ref[...], 0.0)
        o_ref[...] = _masked_log_softmax(h2, valid_cols).astype(o_ref.dtype)

    return kernel


def _fused_small(x, adj, w1, b1, w2, b2, *, out_dtype, valid_cols, vmem_limit):
    n_p = adj.shape[0]
    h_p = w1.shape[1]
    return pl.pallas_call(
        _make_fused_small_kernel(valid_cols),
        out_shape=jax.ShapeDtypeStruct((n_p, h_p), out_dtype),
        compiler_params=pltpu.CompilerParams(vmem_limit_bytes=vmem_limit),
    )(x, adj, w1, b1, w2, b2)


# ---------------------------------------------------------------------------
# Full GCN forward
# ---------------------------------------------------------------------------
def prepare_adj(adj, pad_multiple=_PAD):
    """Hoisted out of the forward path: pad + bf16-cast the (static) adjacency once."""
    n = adj.shape[0]
    n_p = _round_up(n, pad_multiple)
    return jnp.pad(adj, ((0, n_p - n), (0, n_p - n))).astype(jnp.bfloat16)


def gcn_forward(x, adj, w1, b1, w2, b2, *, prepared_adj=None,
                allow_fused_small=True, allow_resident=True):
    n, nfeat = x.shape
    nhid = w1.shape[1]

    f32, bf16 = jnp.float32, jnp.bfloat16

    n_p = _round_up(n, _PAD)
    f_p = _round_up(nfeat, _PAD)
    h_p = _round_up(nhid, _PAD)

    def pad2(a, rows, cols):
        return jnp.pad(a, ((0, rows - a.shape[0]), (0, cols - a.shape[1])))

    if prepared_adj is not None:
        if prepared_adj.shape != (n_p, n_p) or prepared_adj.dtype != bf16:
            raise ValueError("prepared_adj must be the output of prepare_adj(adj)")
        adj_p = prepared_adj
    else:
        if adj is None:
            raise ValueError("either adj or prepared_adj must be provided")
        adj_p = pad2(adj, n_p, n_p).astype(bf16)

    x_p = pad2(x, n_p, f_p).astype(bf16)
    w1_p = pad2(w1, f_p, h_p).astype(bf16)
    w2_p = pad2(w2, h_p, h_p).astype(bf16)
    b1_p = jnp.pad(b1, (0, h_p - nhid)).reshape(1, h_p).astype(f32)
    b2_p = jnp.pad(b2, (0, h_p - nhid)).reshape(1, h_p).astype(f32)

    vmem_limit = _vmem_limit_bytes()
    budget = int(vmem_limit * 0.8)

    # ---- whole-network fused path for small graphs (single pallas_call) ----
    fused_bytes = (n_p * f_p * 2 + n_p * n_p * 2 + f_p * h_p * 2 + h_p * h_p * 2
                   + 2 * h_p * 4 + 4 * n_p * h_p * 4)
    if allow_fused_small and fused_bytes <= vmem_limit // 2:
        out_p = _fused_small(x_p, adj_p, w1_p, b1_p, w2_p, b2_p,
                             out_dtype=f32, valid_cols=nhid, vmem_limit=vmem_limit)
        return out_p[:n, :nhid]

    # ---- general tiled path -------------------------------------------------
    tm = _tile(n_p)        # node-row tile
    tk_nodes = _tile(n_p)  # reduction over adj columns
    tk_feat = _tile(f_p)   # reduction over input features
    tk_hid = _tile(h_p)    # reduction over hidden dim
    tn_hid = _tile(h_p)    # hidden tile for the X@W phase

    # GraphConvolution 1: support = X @ W1, then H1 = relu(adj @ support + b1)
    s1 = _matmul(x_p, w1_p, out_dtype=bf16, tm=tm, tn=tn_hid, tk=tk_feat,
                 vmem_limit=vmem_limit)
    l1_resident_bytes = (n_p * h_p * 2 + 2 * tm * tk_nodes * 2
                         + tm * h_p * 4 + 2 * tm * h_p * 2 + h_p * 4)
    resident1 = allow_resident and l1_resident_bytes <= budget
    h1 = _aggregate(adj_p, s1, b1_p, out_dtype=bf16, tm=tm, tk=tk_nodes,
                    apply_log_softmax=False, valid_cols=nhid,
                    resident=resident1, vmem_limit=vmem_limit)

    # F.dropout(x, 0.5, training=self.training): eval-mode semantics -> identity.
    # TODO(synk): training-mode dropout mask (pltpu.prng_seed/prng_random_bits) not emitted.

    # GraphConvolution 2 + log_softmax: fuse H1 @ W2 into the aggregation when
    # H1 and W2 both fit resident in VMEM (removes the s2 HBM round trip).
    l2_fused_bytes = (n_p * h_p * 2 + h_p * h_p * 2 + 2 * tm * tk_nodes * 2
                      + tm * h_p * 4 + 2 * tm * h_p * 4 + h_p * 4)
    if allow_resident and l2_fused_bytes <= budget:
        out_p = _aggregate_fused(adj_p, h1, w2_p, b2_p, out_dtype=f32, tm=tm,
                                 tk=tk_nodes, apply_log_softmax=True,
                                 valid_cols=nhid, vmem_limit=vmem_limit)
    else:
        s2 = _matmul(h1, w2_p, out_dtype=bf16, tm=tm, tn=tn_hid, tk=tk_hid,
                     vmem_limit=vmem_limit)
        l2_resident_bytes = (n_p * h_p * 2 + 2 * tm * tk_nodes * 2
                             + tm * h_p * 4 + 2 * tm * h_p * 4 + h_p * 4)
        resident2 = allow_resident and l2_resident_bytes <= budget
        out_p = _aggregate(adj_p, s2, b2_p, out_dtype=f32, tm=tm, tk=tk_nodes,
                           apply_log_softmax=True, valid_cols=nhid,
                           resident=resident2, vmem_limit=vmem_limit)

    # Padded rows/cols contain garbage after log_softmax; this slice is load-bearing.
    return out_p[:n, :nhid]


# ---------------------------------------------------------------------------
# References
# ---------------------------------------------------------------------------
def gcn_reference_f32(x, adj, w1, b1, w2, b2):
    h1 = jnp.maximum(adj @ (x @ w1) + b1[None, :], 0.0)
    h2 = jnp.maximum(adj @ (h1 @ w2) + b2[None, :], 0.0)
    return jax.nn.log_softmax(h2, axis=1)


def gcn_reference_bf16(x, adj, w1, b1, w2, b2):
    # Mimics the kernel numerics: bf16 matmul inputs, f32 accumulation/epilogue.
    bf = jnp.bfloat16

    def mm(a, b):
        return jnp.dot(a.astype(bf), b.astype(bf),
                       preferred_element_type=jnp.float32)

    s1 = mm(x, w1).astype(bf)
    h1 = jnp.maximum(mm(adj, s1) + b1[None, :], 0.0).astype(bf)
    s2 = mm(h1, w2).astype(bf)
    h2 = jnp.maximum(mm(adj, s2) + b2[None, :], 0.0)
    return jax.nn.log_softmax(h2, axis=1)


# ---------------------------------------------------------------------------
# Test driver
# ---------------------------------------------------------------------------
def _make_inputs(key, n, nfeat, nhid):
    k_x, k_adj, k_w1, k_b1, k_w2, k_b2 = jax.random.split(key, 6)
    x = jax.random.normal(k_x, (n, nfeat), dtype=jnp.float32)
    # Dense symmetric row-normalized adjacency (with self loops), deterministic.
    a = (jax.random.uniform(k_adj, (n, n)) < 0.1).astype(jnp.float32)
    a = jnp.maximum(a, a.T) + jnp.eye(n, dtype=jnp.float32)
    adj = a / jnp.sum(a, axis=1, keepdims=True)
    w1 = jax.random.uniform(k_w1, (nfeat, nhid), minval=-0.1, maxval=0.1,
                            dtype=jnp.float32)
    b1 = jax.random.uniform(k_b1, (nhid,), minval=-0.1, maxval=0.1,
                            dtype=jnp.float32)
    w2 = jax.random.uniform(k_w2, (nhid, nhid), minval=-0.1, maxval=0.1,
                            dtype=jnp.float32)
    b2 = jax.random.uniform(k_b2, (nhid,), minval=-0.1, maxval=0.1,
                            dtype=jnp.float32)
    return x, adj, w1, b1, w2, b2


def _check(out, x, adj, w1, b1, w2, b2, tol_bf16, tol_f32):
    assert bool(jnp.all(jnp.isfinite(out)))
    ref_bf16 = gcn_reference_bf16(x, adj, w1, b1, w2, b2)
    err_bf16 = float(jnp.max(jnp.abs(out - ref_bf16)))
    assert jnp.allclose(out, ref_bf16, atol=tol_bf16, rtol=tol_bf16), err_bf16
    ref_f32 = gcn_reference_f32(x, adj, w1, b1, w2, b2)
    err_f32 = float(jnp.max(jnp.abs(out - ref_f32)))
    assert jnp.allclose(out, ref_f32, atol=tol_f32, rtol=tol_f32), err_f32


if __name__ == "__main__":
    fwd = jax.jit(functools.partial(gcn_forward),
                  static_argnames=("allow_fused_small", "allow_resident"))

    # 1) Small graph -> single fully-fused pallas_call (everything VMEM resident).
    x, adj, w1, b1, w2, b2 = _make_inputs(jax.random.PRNGKey(0),
                                          n=64, nfeat=16, nhid=32)
    adj_prep = prepare_adj(adj)   # hoisted pad + bf16 cast (graph is static)
    out = fwd(x, None, w1, b1, w2, b2, prepared_adj=adj_prep)
    out = jax.block_until_ready(out)
    assert out.shape == (64, 32)
    _check(out, x, adj, w1, b1, w2, b2, tol_bf16=1e-2, tol_f32=5e-2)

    # 2) Larger graph: force the tiled path (resident support + fused layer-2).
    x2, adj2, w12, b12, w22, b22 = _make_inputs(jax.random.PRNGKey(1),
                                                n=600, nfeat=80, nhid=48)
    adj2_prep = prepare_adj(adj2)
    out2 = fwd(x2, None, w12, b12, w22, b22, prepared_adj=adj2_prep,
               allow_fused_small=False)
    out2 = jax.block_until_ready(out2)
    assert out2.shape == (600, 48)
    _check(out2, x2, adj2, w12, b12, w22, b22, tol_bf16=2e-2, tol_f32=5e-2)

    # 3) Same graph: force the streamed fallback (huge-graph / v7x VMEM-pressure path).
    out3 = fwd(x2, None, w12, b12, w22, b22, prepared_adj=adj2_prep,
               allow_fused_small=False, allow_resident=False)
    out3 = jax.block_until_ready(out3)
    _check(out3, x2, adj2, w12, b12, w22, b22, tol_bf16=2e-2, tol_f32=5e-2)

    print("KERNEL_OK")
</pallas_src>

<mosaic_0001>
module attributes {stable_mosaic.version = 11 : i64} {
  func.func @kernel(%arg0: memref<256x256xbf16, #tpu.memory_space<vmem>>, %arg1: memref<256x256xbf16, #tpu.memory_space<vmem>>, %arg2: memref<256x256xbf16, #tpu.memory_space<vmem>>, %arg3: memref<1x256xf32, #tpu.memory_space<vmem>>, %arg4: memref<256x256xbf16, #tpu.memory_space<vmem>>, %arg5: memref<1x256xf32, #tpu.memory_space<vmem>>, %arg6: memref<256x256xf32, #tpu.memory_space<vmem>>) attributes {dimension_semantics = [], scalar_prefetch = 0 : i64, scratch_operands = 0 : i64, tpu.core_type = #tpu.core_type<tc>} {
    %c0 = arith.constant 0 : index
    %c0_0 = arith.constant 0 : index
    %0 = vector.load %arg1[%c0, %c0_0] : memref<256x256xbf16, #tpu.memory_space<vmem>>, vector<256x256xbf16>
    %c0_1 = arith.constant 0 : index
    %c0_2 = arith.constant 0 : index
    %1 = vector.load %arg0[%c0_1, %c0_2] : memref<256x256xbf16, #tpu.memory_space<vmem>>, vector<256x256xbf16>
    %c0_3 = arith.constant 0 : index
    %c0_4 = arith.constant 0 : index
    %2 = vector.load %arg2[%c0_3, %c0_4] : memref<256x256xbf16, #tpu.memory_space<vmem>>, vector<256x256xbf16>
    %cst = arith.constant dense<0.000000e+00> : vector<256x256xf32>
    %3 = tpu.matmul %1, %2, %cst {dimension_numbers = #tpu.dot_dimension_numbers<[1], [0], [0], [1], [0, 0, 1, 1], [], []>} : vector<256x256xbf16>, vector<256x256xbf16>, vector<256x256xf32> -> vector<256x256xf32>
    %4 = arith.truncf %3 : vector<256x256xf32> to vector<256x256xbf16>
    %cst_5 = arith.constant dense<0.000000e+00> : vector<256x256xf32>
    %5 = tpu.matmul %0, %4, %cst_5 {dimension_numbers = #tpu.dot_dimension_numbers<[1], [0], [0], [1], [0, 0, 1, 1], [], []>} : vector<256x256xbf16>, vector<256x256xbf16>, vector<256x256xf32> -> vector<256x256xf32>
    %c0_6 = arith.constant 0 : index
    %c0_7 = arith.constant 0 : index
    %6 = vector.load %arg3[%c0_6, %c0_7] : memref<1x256xf32, #tpu.memory_space<vmem>>, vector<1x256xf32>
    %7 = vector.broadcast %6 : vector<1x256xf32> to vector<256x256xf32>
    %8 = arith.addf %5, %7 : vector<256x256xf32>
    %cst_8 = arith.constant 0.000000e+00 : f32
    %9 = vector.broadcast %cst_8 : f32 to vector<256x256xf32>
    %10 = arith.maximumf %8, %9 : vector<256x256xf32>
    %11 = arith.truncf %10 : vector<256x256xf32> to vector<256x256xbf16>
    %c0_9 = arith.constant 0 : index
    %c0_10 = arith.constant 0 : index
    %12 = vector.load %arg4[%c0_9, %c0_10] : memref<256x256xbf16, #tpu.memory_space<vmem>>, vector<256x256xbf16>
    %cst_11 = arith.constant dense<0.000000e+00> : vector<256x256xf32>
    %13 = tpu.matmul %11, %12, %cst_11 {dimension_numbers = #tpu.dot_dimension_numbers<[1], [0], [0], [1], [0, 0, 1, 1], [], []>} : vector<256x256xbf16>, vector<256x256xbf16>, vector<256x256xf32> -> vector<256x256xf32>
    %14 = arith.truncf %13 : vector<256x256xf32> to vector<256x256xbf16>
    %cst_12 = arith.constant dense<0.000000e+00> : vector<256x256xf32>
    %15 = tpu.matmul %0, %14, %cst_12 {dimension_numbers = #tpu.dot_dimension_numbers<[1], [0], [0], [1], [0, 0, 1, 1], [], []>} : vector<256x256xbf16>, vector<256x256xbf16>, vector<256x256xf32> -> vector<256x256xf32>
    %c0_13 = arith.constant 0 : index
    %c0_14 = arith.constant 0 : index
    %16 = vector.load %arg5[%c0_13, %c0_14] : memref<1x256xf32, #tpu.memory_space<vmem>>, vector<1x256xf32>
    %17 = vector.broadcast %16 : vector<1x256xf32> to vector<256x256xf32>
    %18 = arith.addf %15, %17 : vector<256x256xf32>
    %cst_15 = arith.constant 0.000000e+00 : f32
    %19 = vector.broadcast %cst_15 : f32 to vector<256x256xf32>
    %20 = arith.maximumf %18, %19 : vector<256x256xf32>
    %21 = tpu.iota {dimensions = array<i32: 1>} : vector<256x256xi32>
    %c32_i32 = arith.constant 32 : i32
    %22 = vector.broadcast %c32_i32 : i32 to vector<256x256xi32>
    %23 = arith.cmpi slt, %21, %22 : vector<256x256xi32>
    %cst_16 = arith.constant 0xFF800000 : f32
    %24 = vector.broadcast %cst_16 : f32 to vector<256x256xf32>
    %25 = arith.select %23, %20, %24 : vector<256x256xi1>, vector<256x256xf32>
    %cst_17 = arith.constant dense<0xFF800000> : vector<256xf32>
    %26 = vector.multi_reduction <maximumf>, %25, %cst_17 [1] : vector<256x256xf32> to vector<256xf32>
    %27 = vector.shape_cast %26 : vector<256xf32> to vector<256x1xf32>
    %28 = vector.broadcast %27 : vector<256x1xf32> to vector<256x256xf32>
    %29 = arith.subf %20, %28 : vector<256x256xf32>
    %30 = math.exp %29 : vector<256x256xf32>
    %cst_18 = arith.constant 0.000000e+00 : f32
    %31 = vector.broadcast %cst_18 : f32 to vector<256x256xf32>
    %32 = arith.select %23, %30, %31 : vector<256x256xi1>, vector<256x256xf32>
    %cst_19 = arith.constant dense<0.000000e+00> : vector<256xf32>
    %33 = vector.multi_reduction <add>, %32, %cst_19 [1] : vector<256x256xf32> to vector<256xf32>
    %34 = vector.shape_cast %33 : vector<256xf32> to vector<256x1xf32>
    %35 = math.log %34 : vector<256x1xf32>
    %36 = vector.broadcast %35 : vector<256x1xf32> to vector<256x256xf32>
    %37 = arith.subf %29, %36 : vector<256x256xf32>
    %c0_20 = arith.constant 0 : index
    %c0_21 = arith.constant 0 : index
    %38 = vector.load %arg6[%c0_20, %c0_21] : memref<256x256xf32, #tpu.memory_space<vmem>>, vector<256x256xf32>
    tpu.vector_store %arg6[%c0_20, %c0_21], %37 {strides = array<i32>} : memref<256x256xf32, #tpu.memory_space<vmem>>, vector<256x256xf32>,
    return
  }
}

</mosaic_0001>

<bundles_post_ra>
// kernel: gcn_forward.1
= control target key start
LH: loop header
LB: loop body
LE: loop exit
PB: predicated region body
PF: predicated region fallthrough
CT: control target
= control target key end

     0   :  { %s4546_s2 = inlined_call_operand.vmem [shape: bf16[256,256], index: 2, kind: input, shape index: {}]   ;;  %s4547_s0 = inlined_call_operand.vmem [shape: bf16[256,256], index: 0, kind: input, shape index: {}]   ;;  %s4548_s1 = inlined_call_operand.vmem [shape: bf16[256,256], index: 1, kind: input, shape index: {}]   ;;  %s4549_s4 = inlined_call_operand.vmem [shape: bf16[256,256], index: 4, kind: input, shape index: {}]   ;;  %s4550_s3 = inlined_call_operand.vmem [shape: f32[1,256], index: 3, kind: input, shape index: {}]   ;;  %s4551_s5 = inlined_call_operand.vmem [shape: f32[1,256], index: 5, kind: input, shape index: {}]   ;;  %s4552_s6 = inlined_call_operand.vmem [shape: f32[256,256], index: 6, kind: output, shape index: {}]  }
   0x1   :  { %v2652_v0 = vld [vmem:[%s4546_s2 + $0x4] ss:$8 sps:$4 sm:$0xff]   ;;  %v2654_v1 = vld [vmem:[%s4546_s2] ss:$8 sps:$4 sm:$0xff]   ;;  %v2655_v2 = vld [vmem:[%s4546_s2 + $0x14] ss:$8 sps:$4 sm:$0xff]  }
   0x2   :  { %439 = vmatprep.subr.bf16.mxu0 %v2652_v0  ;;  %v2657_v3 = vld [vmem:[%s4546_s2 + $0x10] ss:$8 sps:$4 sm:$0xff]   ;;  %v2658_v4 = vld [vmem:[%s4546_s2 + $0x24] ss:$8 sps:$4 sm:$0xff]   ;;  %v2660_v5 = vld [vmem:[%s4546_s2 + $0x20] ss:$8 sps:$4 sm:$0xff]  }
   0x3   :  { %440 = vmatpush1.bf16.msra.mxu0 %v2654_v1  ;;  %v2661_v6 = vld [vmem:[%s4546_s2 + $0x34] ss:$8 sps:$4 sm:$0xff]   ;;  %v2663_v7 = vld [vmem:[%s4546_s2 + $0x30] ss:$8 sps:$4 sm:$0xff]   ;;  %v2664_v8 = vld [vmem:[%s4546_s2 + $0x44] ss:$8 sps:$4 sm:$0xff]  }
   0x4   :  { %441 = vmatprep.subr.bf16.mxu0 %v2655_v2  ;;  %v2666_v9 = vld [vmem:[%s4546_s2 + $0x40] ss:$8 sps:$4 sm:$0xff]   ;;  %v2667_v10 = vld [vmem:[%s4546_s2 + $0x54] ss:$8 sps:$4 sm:$0xff]   ;;  %v2669_v11 = vld [vmem:[%s4546_s2 + $0x50] ss:$8 sps:$4 sm:$0xff]  }
   0x5   :  { %v2670_v12 = vld [vmem:[%s4546_s2 + $0x64] ss:$8 sps:$4 sm:$0xff]   ;;  %v2672_v14 = vld [vmem:[%s4546_s2 + $0x60] ss:$8 sps:$4 sm:$0xff]   ;;  %v2673_v15 = vld [vmem:[%s4546_s2 + $0x74] ss:$8 sps:$4 sm:$0xff]  }
   0x6   :  { %v2702_v13 = vld [vmem:[%s4547_s0 + $0x4] ss:$8 sps:$4 sm:$0xff]   ;;  %v2675_v16 = vld [vmem:[%s4546_s2 + $0x70] ss:$8 sps:$4 sm:$0xff]   ;;  %v2678_v18 = vld [vmem:[%s4546_s2 + $0x80] ss:$8 sps:$4 sm:$0xff]  }
   0x7   :  { %442 = vmatpush1.bf16.msra.mxu0 %v2657_v3  ;;  %471 = vmatprep.mubr.bf16.mxu0 %v2702_v13  ;;  %v2676_v17 = vld [vmem:[%s4546_s2 + $0x84] ss:$8 sps:$4 sm:$0xff]   ;;  %v2679_v19 = vld [vmem:[%s4546_s2 + $0x94] ss:$8 sps:$4 sm:$0xff]   ;;  %v2681_v20 = vld [vmem:[%s4546_s2 + $0x90] ss:$8 sps:$4 sm:$0xff]  }
   0x8   :  { %443 = vmatprep.subr.bf16.mxu0 %v2658_v4  ;;  %v2682_v21 = vld [vmem:[%s4546_s2 + $0xa4] ss:$8 sps:$4 sm:$0xff]   ;;  %v2684_v22 = vld [vmem:[%s4546_s2 + $0xa0] ss:$8 sps:$4 sm:$0xff]   ;;  %v2685_v23 = vld [vmem:[%s4546_s2 + $0xb4] ss:$8 sps:$4 sm:$0xff]  }
   0x9   :  { %v2687_v24 = vld [vmem:[%s4546_s2 + $0xb0] ss:$8 sps:$4 sm:$0xff]   ;;  %v2688_v25 = vld [vmem:[%s4546_s2 + $0xc4] ss:$8 sps:$4 sm:$0xff]   ;;  %v2690_v26 = vld [vmem:[%s4546_s2 + $0xc0] ss:$8 sps:$4 sm:$0xff]  }
   0xa   :  { %v2691_v27 = vld [vmem:[%s4546_s2 + $0xd4] ss:$8 sps:$4 sm:$0xff]   ;;  %v2693_v28 = vld [vmem:[%s4546_s2 + $0xd0] ss:$8 sps:$4 sm:$0xff]   ;;  %v2694_v29 = vld [vmem:[%s4546_s2 + $0xe4] ss:$8 sps:$4 sm:$0xff]  }
   0xb   :  { %444 = vmatpush1.bf16.msra.mxu0 %v2660_v5  ;;  %v2696_v30 = vld [vmem:[%s4546_s2 + $0xe0] ss:$8 sps:$4 sm:$0xff]   ;;  %v2697_v31 = vld [vmem:[%s4546_s2 + $0xf4] ss:$8 sps:$4 sm:$0xff]   ;;  %v2699_v32 = vld [vmem:[%s4546_s2 + $0xf0] ss:$8 sps:$4 sm:$0xff]  }
   0xc   :  { %445 = vmatprep.subr.bf16.mxu0 %v2661_v6  ;;  %v2700_v33 = vld [vmem:[%s4547_s0] ss:$8 sps:$4 sm:$0xff]   ;;  %v2703_v34 = vld [vmem:[%s4547_s0 + $0x14] ss:$8 sps:$4 sm:$0xff]   ;;  %v2705_v35 = vld [vmem:[%s4547_s0 + $0x10] ss:$8 sps:$4 sm:$0xff]  }
   0xd   :  { %v2706_v36 = vld [vmem:[%s4547_s0 + $0x24] ss:$8 sps:$4 sm:$0xff]   ;;  %v2708_v37 = vld [vmem:[%s4547_s0 + $0x20] ss:$8 sps:$4 sm:$0xff]   ;;  %v2709_v38 = vld [vmem:[%s4547_s0 + $0x34] ss:$8 sps:$4 sm:$0xff]  }
   0xe   :  { %v2711_v39 = vld [vmem:[%s4547_s0 + $0x30] ss:$8 sps:$4 sm:$0xff]   ;;  %v2712_v40 = vld [vmem:[%s4547_s0 + $0x44] ss:$8 sps:$4 sm:$0xff]   ;;  %v2714_v41 = vld [vmem:[%s4547_s0 + $0x40] ss:$8 sps:$4 sm:$0xff]  }
   0xf   :  { %446 = vmatpush1.bf16.msra.mxu0 %v2663_v7  ;;  %v2715_v42 = vld [vmem:[%s4547_s0 + $0x54] ss:$8 sps:$4 sm:$0xff]   ;;  %v2717_v43 = vld [vmem:[%s4547_s0 + $0x50] ss:$8 sps:$4 sm:$0xff]   ;;  %v2718_v44 = vld [vmem:[%s4547_s0 + $0x64] ss:$8 sps:$4 sm:$0xff]  }
  0x10   :  { %447 = vmatprep.subr.bf16.mxu0 %v2664_v8  ;;  %v2720_v45 = vld [vmem:[%s4547_s0 + $0x60] ss:$8 sps:$4 sm:$0xff]   ;;  %v2721_v46 = vld [vmem:[%s4547_s0 + $0x74] ss:$8 sps:$4 sm:$0xff]   ;;  %v2723_v47 = vld [vmem:[%s4547_s0 + $0x70] ss:$8 sps:$4 sm:$0xff]  }
  0x11   :  { %v2724_v48 = vld [vmem:[%s4547_s0 + $0x84] ss:$8 sps:$4 sm:$0xff]   ;;  %v2726_v49 = vld [vmem:[%s4547_s0 + $0x80] ss:$8 sps:$4 sm:$0xff]   ;;  %v2727_v50 = vld [vmem:[%s4547_s0 + $0x94] ss:$8 sps:$4 sm:$0xff]  }
  0x12   :  { %v2729_v51 = vld [vmem:[%s4547_s0 + $0x90] ss:$8 sps:$4 sm:$0xff]   ;;  %v2730_v52 = vld [vmem:[%s4547_s0 + $0xa4] ss:$8 sps:$4 sm:$0xff]   ;;  %v2732_v53 = vld [vmem:[%s4547_s0 + $0xa0] ss:$8 sps:$4 sm:$0xff]  }
  0x13   :  { %448 = vmatpush1.bf16.msra.mxu0 %v2666_v9  ;;  %v2733_v54 = vld [vmem:[%s4547_s0 + $0xb4] ss:$8 sps:$4 sm:$0xff]   ;;  %v2735_v55 = vld [vmem:[%s4547_s0 + $0xb0] ss:$8 sps:$4 sm:$0xff]   ;;  %v2736_v56 = vld [vmem:[%s4547_s0 + $0xc4] ss:$8 sps:$4 sm:$0xff]  }
  0x14   :  { %449 = vmatprep.subr.bf16.mxu0 %v2667_v10  ;;  %v2738_v57 = vld [vmem:[%s4547_s0 + $0xc0] ss:$8 sps:$4 sm:$0xff]   ;;  %v2739_v58 = vld [vmem:[%s4547_s0 + $0xd4] ss:$8 sps:$4 sm:$0xff]   ;;  %v2741_v59 = vld [vmem:[%s4547_s0 + $0xd0] ss:$8 sps:$4 sm:$0xff]  }
  0x15   :  { %v2742_v60 = vld [vmem:[%s4547_s0 + $0xe4] ss:$8 sps:$4 sm:$0xff]   ;;  %v2744_v61 = vld [vmem:[%s4547_s0 + $0xe0] ss:$8 sps:$4 sm:$0xff]   ;;  %v2745_v62 = vld [vmem:[%s4547_s0 + $0xf4] ss:$8 sps:$4 sm:$0xff]  }
  0x16   :  { %v2747_v63 = vld [vmem:[%s4547_s0 + $0xf0] ss:$8 sps:$4 sm:$0xff]   ;;  %v3202_v1 = vld [vmem:[%s4548_s1 + $0x4] ss:$8 sps:$4 sm:$0xff]  }
  0x17   :  { %450 = vmatpush1.bf16.msra.mxu0 %v2669_v11  ;;  %868 = vmatprep.mubr.bf16.mxu1 %v3202_v1 }
  0x18   :  { %451 = vmatprep.subr.bf16.mxu0 %v2670_v12 }
  0x1b   :  { %452 = vmatpush1.bf16.msra.mxu0 %v2672_v14 }
  0x1c   :  { %453 = vmatprep.subr.bf16.mxu0 %v2673_v15 }
  0x1f   :  { %454 = vmatpush1.bf16.msra.mxu0 %v2675_v16 }
  0x20   :  { %455 = vmatprep.subr.bf16.mxu0 %v2676_v17 }
  0x23   :  { %456 = vmatpush1.bf16.msra.mxu0 %v2678_v18 }
  0x24   :  { %457 = vmatprep.subr.bf16.mxu0 %v2679_v19 }
  0x27   :  { %458 = vmatpush1.bf16.msra.mxu0 %v2681_v20 }
  0x28   :  { %459 = vmatprep.subr.bf16.mxu0 %v2682_v21 }
  0x2b   :  { %460 = vmatpush1.bf16.msra.mxu0 %v2684_v22 }
  0x2c   :  { %461 = vmatprep.subr.bf16.mxu0 %v2685_v23 }
  0x2f   :  { %462 = vmatpush1.bf16.msra.mxu0 %v2687_v24 }
  0x30   :  { %463 = vmatprep.subr.bf16.mxu0 %v2688_v25 }
  0x33   :  { %464 = vmatpush1.bf16.msra.mxu0 %v2690_v26 }
  0x34   :  { %465 = vmatprep.subr.bf16.mxu0 %v2691_v27 }
  0x37   :  { %466 = vmatpush1.bf16.msra.mxu0 %v2693_v28 }
  0x38   :  { %467 = vmatprep.subr.bf16.mxu0 %v2694_v29 }
  0x3b   :  { %468 = vmatpush1.bf16.msra.mxu0 %v2696_v30 }
  0x3c   :  { %469 = vmatprep.subr.bf16.mxu0 %v2697_v31 }
  0x3f   :  { %470 = vmatpush1.bf16.msra.mxu0 %v2699_v32 }
  0x42   :  { %472 = vmatmul.mubr.bf16.vlgmr.msra.gmra.mrb[0].mxu0 %v2700_v33 }
  0x43   :  { %481 = vmatprep.mubr.bf16.mxu0 %v2703_v34 }
  0x4a   :  { %482 = vmatmul.mubr.bf16.gmra.mrb[4].mxu0 %v2705_v35 }
  0x4b   :  { %491 = vmatprep.mubr.bf16.mxu0 %v2706_v36 }
  0x52   :  { %492 = vmatmul.mubr.bf16.gmra.mrb[8].mxu0 %v2708_v37 }
  0x53   :  { %501 = vmatprep.mubr.bf16.mxu0 %v2709_v38 }
  0x5a   :  { %502 = vmatmul.mubr.bf16.gmra.mrb[12].mxu0 %v2711_v39 }
  0x5b   :  { %511 = vmatprep.mubr.bf16.mxu0 %v2712_v40 }
  0x62   :  { %512 = vmatmul.mubr.bf16.gmra.mrb[16].mxu0 %v2714_v41 }
  0x63   :  { %521 = vmatprep.mubr.bf16.mxu0 %v2715_v42 }
  0x6a   :  { %522 = vmatmul.mubr.bf16.gmra.mrb[20].mxu0 %v2717_v43 }
  0x6b   :  { %531 = vmatprep.mubr.bf16.mxu0 %v2718_v44 }
  0x72   :  { %532 = vmatmul.mubr.bf16.gmra.mrb[24].mxu0 %v2720_v45 }
  0x73   :  { %541 = vmatprep.mubr.bf16.mxu0 %v2721_v46 }
  0x7a   :  { %542 = vmatmul.mubr.bf16.gmra.mrb[28].mxu0 %v2723_v47 }
  0x7b   :  { %551 = vmatprep.mubr.bf16.mxu0 %v2724_v48 }
  0x82   :  { %552 = vmatmul.mubr.bf16.gmra.mrb[32].mxu0 %v2726_v49 }
  0x83   :  { %561 = vmatprep.mubr.bf16.mxu0 %v2727_v50 }
  0x8a   :  { %562 = vmatmul.mubr.bf16.gmra.mrb[36].mxu0 %v2729_v51 }
  0x8b   :  { %571 = vmatprep.mubr.bf16.mxu0 %v2730_v52 }
  0x92   :  { %572 = vmatmul.mubr.bf16.gmra.mrb[40].mxu0 %v2732_v53 }
  0x93   :  { %581 = vmatprep.mubr.bf16.mxu0 %v2733_v54 }
  0x9a   :  { %582 = vmatmul.mubr.bf16.gmra.mrb[44].mxu0 %v2735_v55 }
  0x9b   :  { %591 = vmatprep.mubr.bf16.mxu0 %v2736_v56 }
  0xa2   :  { %592 = vmatmul.mubr.bf16.gmra.mrb[48].mxu0 %v2738_v57 }
  0xa3   :  { %601 = vmatprep.mubr.bf16.mxu0 %v2739_v58 }
  0xaa   :  { %602 = vmatmul.mubr.bf16.gmra.mrb[52].mxu0 %v2741_v59 }
  0xab   :  { %611 = vmatprep.mubr.bf16.mxu0 %v2742_v60 }
  0xb2   :  { %612 = vmatmul.mubr.bf16.gmra.mrb[56].mxu0 %v2744_v61 }
  0xb3   :  { %621 = vmatprep.mubr.bf16.mxu0 %v2745_v62 }
  0xba   :  { %622 = vmatmul.mubr.bf16.gmra.mrb[60].mxu0 %v2747_v63 }
 0x115   :  { %v473_v0 = vpop.f32.mrb[0].mxu0 }
 0x116   :  { %v475_v2 = vpop.f32.mrb[1].mxu0 }
 0x117   :  { %v477_v3 = vpop.f32.mrb[2].mxu0 }
 0x118   :  { %v632_v4 = vpack.c.bf16 %v477_v3, %v473_v0  ;;  %v479_v5 = vpop.f32.mrb[3].mxu0 }
 0x119   :  { %v633_v6 = vpack.c.bf16 %v479_v5, %v475_v2 }
 0x11b   :  { %836 = vmatprep.subr.bf16.mxu1 %v633_v6 }
 0x11c   :  { %837 = vmatpush1.bf16.msra.mxu1 %v632_v4 }
 0x11d   :  { %v483_v7 = vpop.f32.mrb[4].mxu0 }
 0x11e   :  { %v485_v8 = vpop.f32.mrb[5].mxu0 }
 0x11f   :  { %v487_v9 = vpop.f32.mrb[6].mxu0 }
 0x120   :  { %v634_v10 = vpack.c.bf16 %v487_v9, %v483_v7  ;;  %v489_v11 = vpop.f32.mrb[7].mxu0 }
 0x121   :  { %v635_v12 = vpack.c.bf16 %v489_v11, %v485_v8 }
 0x123   :  { %838 = vmatprep.subr.bf16.mxu1 %v635_v12 }
 0x124   :  { %839 = vmatpush1.bf16.msra.mxu1 %v634_v10 }
 0x125   :  { %v493_v13 = vpop.f32.mrb[8].mxu0 }
 0x126   :  { %v495_v14 = vpop.f32.mrb[9].mxu0 }
 0x127   :  { %v497_v15 = vpop.f32.mrb[10].mxu0 }
 0x128   :  { %v636_v16 = vpack.c.bf16 %v497_v15, %v493_v13  ;;  %v499_v17 = vpop.f32.mrb[11].mxu0  ;;  %v2787_v15 = vld [vmem:[%s4549_s4] ss:$8 sps:$4 sm:$0xff]  }
 0x129   :  { %v637_v18 = vpack.c.bf16 %v499_v17, %v495_v14  ;;  %v2789_v17 = vld [vmem:[%s4549_s4 + $0x4] ss:$8 sps:$4 sm:$0xff]  }
 0x12a   :  { %1317 = vmatprep.subr.bf16.mxu0 %v2789_v17  ;;  %v3394_v17 = vld [vmem:[%s4548_s1 + $0x80] ss:$8 sps:$4 sm:$0xff]  }
 0x12b   :  { %840 = vmatprep.subr.bf16.mxu1 %v637_v18  ;;  %1318 = vmatpush1.bf16.msra.mxu0 %v2787_v15  ;;  %v3382_v15 = vld [vmem:[%s4548_s1 + $0x70] ss:$8 sps:$4 sm:$0xff]  }
 0x12c   :  { %841 = vmatpush1.bf16.msra.mxu1 %v636_v16 }
 0x12d   :  { %v503_v19 = vpop.f32.mrb[12].mxu0 }
 0x12e   :  { %v505_v20 = vpop.f32.mrb[13].mxu0 }
 0x12f   :  { %v507_v21 = vpop.f32.mrb[14].mxu0 }
 0x130   :  { %v638_v22 = vpack.c.bf16 %v507_v21, %v503_v19  ;;  %v509_v23 = vpop.f32.mrb[15].mxu0  ;;  %v2793_v21 = vld [vmem:[%s4549_s4 + $0x10] ss:$8 sps:$4 sm:$0xff]  }
 0x131   :  { %v639_v24 = vpack.c.bf16 %v509_v23, %v505_v20 }
 0x133   :  { %842 = vmatprep.subr.bf16.mxu1 %v639_v24 }
 0x134   :  { %843 = vmatpush1.bf16.msra.mxu1 %v638_v22  ;;  %v2795_v22 = vld [vmem:[%s4549_s4 + $0x14] ss:$8 sps:$4 sm:$0xff]  }
 0x135   :  { %v513_v25 = vpop.f32.mrb[16].mxu0  ;;  %1319 = vmatprep.subr.bf16.mxu0 %v2795_v22  ;;  %v3423_v22 = vld [vmem:[%s4548_s1 + $0xb4] ss:$8 sps:$4 sm:$0xff]  }
 0x136   :  { %v515_v26 = vpop.f32.mrb[17].mxu0  ;;  %1320 = vmatpush1.bf16.msra.mxu0 %v2793_v21  ;;  %v3418_v21 = vld [vmem:[%s4548_s1 + $0xa0] ss:$8 sps:$4 sm:$0xff]  }
 0x137   :  { %v517_v27 = vpop.f32.mrb[18].mxu0 }
 0x138   :  { %v640_v28 = vpack.c.bf16 %v517_v27, %v513_v25  ;;  %v519_v29 = vpop.f32.mrb[19].mxu0 }
 0x139   :  { %v641_v30 = vpack.c.bf16 %v519_v29, %v515_v26  ;;  %v2799_v29 = vld [vmem:[%s4549_s4 + $0x20] ss:$8 sps:$4 sm:$0xff]  }
 0x13b   :  { %844 = vmatprep.subr.bf16.mxu1 %v641_v30  ;;  %v2801_v30 = vld [vmem:[%s4549_s4 + $0x24] ss:$8 sps:$4 sm:$0xff]  }
 0x13c   :  { %845 = vmatpush1.bf16.msra.mxu1 %v640_v28  ;;  %1321 = vmatprep.subr.bf16.mxu0 %v2801_v30  ;;  %v3465_v30 = vld [vmem:[%s4548_s1 + $0xe4] ss:$8 sps:$4 sm:$0xff]  }
 0x13d   :  { %v523_v31 = vpop.f32.mrb[20].mxu0  ;;  %1322 = vmatpush1.bf16.msra.mxu0 %v2799_v29  ;;  %v3460_v29 = vld [vmem:[%s4548_s1 + $0xd0] ss:$8 sps:$4 sm:$0xff]  }
 0x13e   :  { %v525_v32 = vpop.f32.mrb[21].mxu0 }
 0x13f   :  { %v527_v33 = vpop.f32.mrb[22].mxu0 }
 0x140   :  { %v642_v34 = vpack.c.bf16 %v527_v33, %v523_v31  ;;  %v529_v35 = vpop.f32.mrb[23].mxu0 }
 0x141   :  { %v643_v36 = vpack.c.bf16 %v529_v35, %v525_v32 }
 0x143   :  { %846 = vmatprep.subr.bf16.mxu1 %v643_v36 }
 0x144   :  { %847 = vmatpush1.bf16.msra.mxu1 %v642_v34 }
 0x145   :  { %v533_v37 = vpop.f32.mrb[24].mxu0 }
 0x146   :  { %v535_v38 = vpop.f32.mrb[25].mxu0 }
 0x147   :  { %v537_v39 = vpop.f32.mrb[26].mxu0 }
 0x148   :  { %v644_v40 = vpack.c.bf16 %v537_v39, %v533_v37  ;;  %v539_v41 = vpop.f32.mrb[27].mxu0  ;;  %v2805_v37 = vld [vmem:[%s4549_s4 + $0x30] ss:$8 sps:$4 sm:$0xff]  }
 0x149   :  { %v645_v42 = vpack.c.bf16 %v539_v41, %v535_v38  ;;  %v2807_v38 = vld [vmem:[%s4549_s4 + $0x34] ss:$8 sps:$4 sm:$0xff]   ;;  %v2810_v41 = vld [vmem:[%s4549_s4 + $0x44] ss:$8 sps:$4 sm:$0xff]  }
 0x14a   :  { %1323 = vmatprep.subr.bf16.mxu0 %v2807_v38 }
 0x14b   :  { %848 = vmatprep.subr.bf16.mxu1 %v645_v42  ;;  %1324 = vmatpush1.bf16.msra.mxu0 %v2805_v37  ;;  %v664_v37 = vld [vmem:[%s4550_s3] sm:$0x3] }
 0x14c   :  { %849 = vmatpush1.bf16.msra.mxu1 %v644_v40  ;;  %1325 = vmatprep.subr.bf16.mxu0 %v2810_v41 }
 0x14d   :  { %v543_v43 = vpop.f32.mrb[28].mxu0 }
 0x14e   :  { %v545_v44 = vpop.f32.mrb[29].mxu0 }
 0x14f   :  { %v547_v45 = vpop.f32.mrb[30].mxu0 }
 0x150   :  { %v646_v46 = vpack.c.bf16 %v547_v45, %v543_v43  ;;  %v549_v47 = vpop.f32.mrb[31].mxu0  ;;  %v2808_v43 = vld [vmem:[%s4549_s4 + $0x40] ss:$8 sps:$4 sm:$0xff]   ;;  %v2813_v45 = vld [vmem:[%s4549_s4 + $0x54] ss:$8 sps:$4 sm:$0xff]  }
 0x151   :  { %v647_v48 = vpack.c.bf16 %v549_v47, %v545_v44  ;;  %v3238_v44 = vld [vmem:[%s4548_s1] ss:$8 sps:$4 sm:$0xff]   ;;  %1326 = vmatpush1.bf16.msra.mxu0 %v2808_v43  ;;  %v2811_v47 = vld [vmem:[%s4549_s4 + $0x50] ss:$8 sps:$4 sm:$0xff]  }
 0x152   :  { %1327 = vmatprep.subr.bf16.mxu0 %v2813_v45 }
 0x153   :  { %850 = vmatprep.subr.bf16.mxu1 %v647_v48  ;;  %v2816_v48 = vld [vmem:[%s4549_s4 + $0x64] ss:$8 sps:$4 sm:$0xff]  }
 0x154   :  { %851 = vmatpush1.bf16.msra.mxu1 %v646_v46  ;;  %v3246_v46 = vld [vmem:[%s4548_s1 + $0x14] ss:$8 sps:$4 sm:$0xff]  }
 0x155   :  { %v553_v49 = vpop.f32.mrb[32].mxu0  ;;  %1328 = vmatpush1.bf16.msra.mxu0 %v2811_v47 }
 0x156   :  { %v555_v50 = vpop.f32.mrb[33].mxu0  ;;  %1329 = vmatprep.subr.bf16.mxu0 %v2816_v48 }
 0x157   :  { %v557_v51 = vpop.f32.mrb[34].mxu0 }
 0x158   :  { %v648_v52 = vpack.c.bf16 %v557_v51, %v553_v49  ;;  %v559_v53 = vpop.f32.mrb[35].mxu0  ;;  %v2814_v49 = vld [vmem:[%s4549_s4 + $0x60] ss:$8 sps:$4 sm:$0xff]   ;;  %v2819_v51 = vld [vmem:[%s4549_s4 + $0x74] ss:$8 sps:$4 sm:$0xff]  }
 0x159   :  { %v649_v54 = vpack.c.bf16 %v559_v53, %v555_v50  ;;  %v3262_v50 = vld [vmem:[%s4548_s1 + $0x10] ss:$8 sps:$4 sm:$0xff]   ;;  %1330 = vmatpush1.bf16.msra.mxu0 %v2814_v49 }
 0x15a   :  { %v2817_v53 = vld [vmem:[%s4549_s4 + $0x70] ss:$8 sps:$4 sm:$0xff]   ;;  %1331 = vmatprep.subr.bf16.mxu0 %v2819_v51 }
 0x15b   :  { %852 = vmatprep.subr.bf16.mxu1 %v649_v54  ;;  %v2822_v54 = vld [vmem:[%s4549_s4 + $0x84] ss:$8 sps:$4 sm:$0xff]  }
 0x15c   :  { %853 = vmatpush1.bf16.msra.mxu1 %v648_v52  ;;  %v3270_v52 = vld [vmem:[%s4548_s1 + $0x24] ss:$8 sps:$4 sm:$0xff]  }
 0x15d   :  { %v563_v55 = vpop.f32.mrb[36].mxu0  ;;  %1332 = vmatpush1.bf16.msra.mxu0 %v2817_v53 }
 0x15e   :  { %v565_v56 = vpop.f32.mrb[37].mxu0  ;;  %1333 = vmatprep.subr.bf16.mxu0 %v2822_v54 }
 0x15f   :  { %v567_v57 = vpop.f32.mrb[38].mxu0 }
 0x160   :  { %v650_v58 = vpack.c.bf16 %v567_v57, %v563_v55  ;;  %v569_v59 = vpop.f32.mrb[39].mxu0  ;;  %v2820_v55 = vld [vmem:[%s4549_s4 + $0x80] ss:$8 sps:$4 sm:$0xff]   ;;  %v2825_v57 = vld [vmem:[%s4549_s4 + $0x94] ss:$8 sps:$4 sm:$0xff]  }
 0x161   :  { %v651_v60 = vpack.c.bf16 %v569_v59, %v565_v56  ;;  %v3286_v56 = vld [vmem:[%s4548_s1 + $0x20] ss:$8 sps:$4 sm:$0xff]   ;;  %1334 = vmatpush1.bf16.msra.mxu0 %v2820_v55  ;;  %v2823_v59 = vld [vmem:[%s4549_s4 + $0x90] ss:$8 sps:$4 sm:$0xff]  }
 0x162   :  { %1335 = vmatprep.subr.bf16.mxu0 %v2825_v57 }
 0x163   :  { %854 = vmatprep.subr.bf16.mxu1 %v651_v60  ;;  %v2828_v60 = vld [vmem:[%s4549_s4 + $0xa4] ss:$8 sps:$4 sm:$0xff]  }
 0x164   :  { %855 = vmatpush1.bf16.msra.mxu1 %v650_v58  ;;  %v3294_v58 = vld [vmem:[%s4548_s1 + $0x34] ss:$8 sps:$4 sm:$0xff]  }
 0x165   :  { %v573_v61 = vpop.f32.mrb[40].mxu0  ;;  %1336 = vmatpush1.bf16.msra.mxu0 %v2823_v59 }
 0x166   :  { %v575_v62 = vpop.f32.mrb[41].mxu0  ;;  %1337 = vmatprep.subr.bf16.mxu0 %v2828_v60 }
 0x167   :  { %v577_v63 = vpop.f32.mrb[42].mxu0 }
 0x168   :  { %v652_v0 = vpack.c.bf16 %v577_v63, %v573_v61  ;;  %v579_v2 = vpop.f32.mrb[43].mxu0  ;;  %v2826_v61 = vld [vmem:[%s4549_s4 + $0xa0] ss:$8 sps:$4 sm:$0xff]   ;;  %v2831_v63 = vld [vmem:[%s4549_s4 + $0xb4] ss:$8 sps:$4 sm:$0xff]  }
 0x169   :  { %v653_v3 = vpack.c.bf16 %v579_v2, %v575_v62  ;;  %v3310_v62 = vld [vmem:[%s4548_s1 + $0x30] ss:$8 sps:$4 sm:$0xff]   ;;  %1338 = vmatpush1.bf16.msra.mxu0 %v2826_v61 }
 0x16a   :  { %v2829_v2 = vld [vmem:[%s4549_s4 + $0xb0] ss:$8 sps:$4 sm:$0xff]   ;;  %1339 = vmatprep.subr.bf16.mxu0 %v2831_v63 }
 0x16b   :  { %856 = vmatprep.subr.bf16.mxu1 %v653_v3  ;;  %v2834_v3 = vld [vmem:[%s4549_s4 + $0xc4] ss:$8 sps:$4 sm:$0xff]  }
 0x16c   :  { %857 = vmatpush1.bf16.msra.mxu1 %v652_v0  ;;  %v3318_v0 = vld [vmem:[%s4548_s1 + $0x44] ss:$8 sps:$4 sm:$0xff]  }
 0x16d   :  { %v583_v4 = vpop.f32.mrb[44].mxu0  ;;  %1340 = vmatpush1.bf16.msra.mxu0 %v2829_v2 }
 0x16e   :  { %v585_v5 = vpop.f32.mrb[45].mxu0  ;;  %1341 = vmatprep.subr.bf16.mxu0 %v2834_v3 }
 0x16f   :  { %v587_v6 = vpop.f32.mrb[46].mxu0 }
 0x170   :  { %v654_v7 = vpack.c.bf16 %v587_v6, %v583_v4  ;;  %v589_v8 = vpop.f32.mrb[47].mxu0  ;;  %v2832_v4 = vld [vmem:[%s4549_s4 + $0xc0] ss:$8 sps:$4 sm:$0xff]   ;;  %v2837_v6 = vld [vmem:[%s4549_s4 + $0xd4] ss:$8 sps:$4 sm:$0xff]  }
 0x171   :  { %v655_v9 = vpack.c.bf16 %v589_v8, %v585_v5  ;;  %v3334_v5 = vld [vmem:[%s4548_s1 + $0x40] ss:$8 sps:$4 sm:$0xff]   ;;  %1342 = vmatpush1.bf16.msra.mxu0 %v2832_v4  ;;  %v2835_v8 = vld [vmem:[%s4549_s4 + $0xd0] ss:$8 sps:$4 sm:$0xff]  }
 0x172   :  { %1343 = vmatprep.subr.bf16.mxu0 %v2837_v6 }
 0x173   :  { %858 = vmatprep.subr.bf16.mxu1 %v655_v9  ;;  %v2840_v9 = vld [vmem:[%s4549_s4 + $0xe4] ss:$8 sps:$4 sm:$0xff]  }
 0x174   :  { %859 = vmatpush1.bf16.msra.mxu1 %v654_v7  ;;  %v3342_v7 = vld [vmem:[%s4548_s1 + $0x54] ss:$8 sps:$4 sm:$0xff]  }
 0x175   :  { %v593_v10 = vpop.f32.mrb[48].mxu0  ;;  %1344 = vmatpush1.bf16.msra.mxu0 %v2835_v8 }
 0x176   :  { %v595_v11 = vpop.f32.mrb[49].mxu0  ;;  %1345 = vmatprep.subr.bf16.mxu0 %v2840_v9 }
 0x177   :  { %v597_v12 = vpop.f32.mrb[50].mxu0 }
 0x178   :  { %v656_v13 = vpack.c.bf16 %v597_v12, %v593_v10  ;;  %v599_v14 = vpop.f32.mrb[51].mxu0  ;;  %v2838_v10 = vld [vmem:[%s4549_s4 + $0xe0] ss:$8 sps:$4 sm:$0xff]   ;;  %v3363_v12 = vld [vmem:[%s4548_s1 + $0x64] ss:$8 sps:$4 sm:$0xff]  }
 0x179   :  { %v657_v16 = vpack.c.bf16 %v599_v14, %v595_v11  ;;  %v3358_v11 = vld [vmem:[%s4548_s1 + $0x50] ss:$8 sps:$4 sm:$0xff]   ;;  %1346 = vmatpush1.bf16.msra.mxu0 %v2838_v10  ;;  %v3375_v14 = vld [vmem:[%s4548_s1 + $0x74] ss:$8 sps:$4 sm:$0xff]  }
 0x17b   :  { %860 = vmatprep.subr.bf16.mxu1 %v657_v16  ;;  %v3387_v16 = vld [vmem:[%s4548_s1 + $0x84] ss:$8 sps:$4 sm:$0xff]  }
 0x17c   :  { %861 = vmatpush1.bf16.msra.mxu1 %v656_v13  ;;  %v3370_v13 = vld [vmem:[%s4548_s1 + $0x60] ss:$8 sps:$4 sm:$0xff]  }
 0x17d   :  { %v603_v18 = vpop.f32.mrb[52].mxu0 }
 0x17e   :  { %v605_v19 = vpop.f32.mrb[53].mxu0 }
 0x17f   :  { %v607_v20 = vpop.f32.mrb[54].mxu0 }
 0x180   :  { %v658_v23 = vpack.c.bf16 %v607_v20, %v603_v18  ;;  %v609_v24 = vpop.f32.mrb[55].mxu0  ;;  %v3399_v18 = vld [vmem:[%s4548_s1 + $0x94] ss:$8 sps:$4 sm:$0xff]   ;;  %v3411_v20 = vld [vmem:[%s4548_s1 + $0xa4] ss:$8 sps:$4 sm:$0xff]  }
 0x181   :  { %v659_v25 = vpack.c.bf16 %v609_v24, %v605_v19  ;;  %v3406_v19 = vld [vmem:[%s4548_s1 + $0x90] ss:$8 sps:$4 sm:$0xff]   ;;  %v3435_v24 = vld [vmem:[%s4548_s1 + $0xc4] ss:$8 sps:$4 sm:$0xff]  }
 0x183   :  { %862 = vmatprep.subr.bf16.mxu1 %v659_v25  ;;  %v2843_v25 = vld [vmem:[%s4549_s4 + $0xf4] ss:$8 sps:$4 sm:$0xff]  }
 0x184   :  { %863 = vmatpush1.bf16.msra.mxu1 %v658_v23  ;;  %v3430_v23 = vld [vmem:[%s4548_s1 + $0xb0] ss:$8 sps:$4 sm:$0xff]   ;;  %1347 = vmatprep.subr.bf16.mxu0 %v2843_v25 }
 0x185   :  { %v613_v26 = vpop.f32.mrb[56].mxu0 }
 0x186   :  { %v615_v27 = vpop.f32.mrb[57].mxu0 }
 0x187   :  { %v617_v28 = vpop.f32.mrb[58].mxu0 }
 0x188   :  { %v660_v31 = vpack.c.bf16 %v617_v28, %v613_v26  ;;  %v619_v32 = vpop.f32.mrb[59].mxu0  ;;  %v2841_v26 = vld [vmem:[%s4549_s4 + $0xf0] ss:$8 sps:$4 sm:$0xff]   ;;  %v3453_v28 = vld [vmem:[%s4548_s1 + $0xd4] ss:$8 sps:$4 sm:$0xff]  }
 0x189   :  { %v661_v33 = vpack.c.bf16 %v619_v32, %v615_v27  ;;  %1348 = vmatpush1.bf16.msra.mxu0 %v2841_v26  ;;  %v3448_v27 = vld [vmem:[%s4548_s1 + $0xc0] ss:$8 sps:$4 sm:$0xff]   ;;  %v3477_v32 = vld [vmem:[%s4548_s1 + $0xf4] ss:$8 sps:$4 sm:$0xff]  }
 0x18b   :  { %864 = vmatprep.subr.bf16.mxu1 %v661_v33  ;;  %v3484_v33 = vld [vmem:[%s4548_s1 + $0xf0] ss:$8 sps:$4 sm:$0xff]  }
 0x18c   :  { %865 = vmatpush1.bf16.msra.mxu1 %v660_v31  ;;  %v3472_v31 = vld [vmem:[%s4548_s1 + $0xe0] ss:$8 sps:$4 sm:$0xff]  }
 0x18d   :  { %v623_v34 = vpop.f32.mrb[60].mxu0 }
 0x18e   :  { %v625_v35 = vpop.f32.mrb[61].mxu0 }
 0x18f   :  { %v627_v36 = vpop.f32.mrb[62].mxu0 }
 0x190   :  { %v662_v39 = vpack.c.bf16 %v627_v36, %v623_v34  ;;  %v629_v40 = vpop.f32.mrb[63].mxu0  ;;  %v666_v34 = vlaneseq }
 0x191   :  { %v663_v42 = vpack.c.bf16 %v629_v40, %v625_v35 }
 0x192   :  { %v3489_v35 = vshrl.u32 %v666_v34, 7 }
 0x193   :  { %866 = vmatprep.subr.bf16.mxu1 %v663_v42 }
 0x194   :  { %867 = vmatpush1.bf16.msra.mxu1 %v662_v39  ;;  %v668_v36 = vsub.s32 0, %v3489_v35  ;;  %v4577_v38 = vsub.s32 1, %v3489_v35 }
 0x196   :  { %v3498_v39 = vrot.slane %v664_v37, %v668_v36  ;;  %v3502_v40 = vrot.slane %v664_v37, %v4577_v38 }
 0x197   :  { %869 = vmatmul.mubr.bf16.vlgmr.msra.gmra.mrb[0].mxu1 %v3238_v44 }
 0x198   :  { %878 = vmatprep.mubr.bf16.mxu1 %v3246_v46 }
 0x19f   :  { %879 = vmatmul.mubr.bf16.gmra.mrb[4].mxu1 %v3262_v50 }
 0x1a0   :  { %888 = vmatprep.mubr.bf16.mxu1 %v3270_v52 }
 0x1a7   :  { %889 = vmatmul.mubr.bf16.gmra.mrb[8].mxu1 %v3286_v56 }
 0x1a8   :  { %898 = vmatprep.mubr.bf16.mxu1 %v3294_v58 }
 0x1af   :  { %899 = vmatmul.mubr.bf16.gmra.mrb[12].mxu1 %v3310_v62 }
 0x1b0   :  { %908 = vmatprep.mubr.bf16.mxu1 %v3318_v0 }
 0x1b7   :  { %909 = vmatmul.mubr.bf16.gmra.mrb[16].mxu1 %v3334_v5 }
 0x1b8   :  { %918 = vmatprep.mubr.bf16.mxu1 %v3342_v7 }
 0x1bf   :  { %919 = vmatmul.mubr.bf16.gmra.mrb[20].mxu1 %v3358_v11 }
 0x1c0   :  { %928 = vmatprep.mubr.bf16.mxu1 %v3363_v12 }
 0x1c7   :  { %929 = vmatmul.mubr.bf16.gmra.mrb[24].mxu1 %v3370_v13 }
 0x1c8   :  { %938 = vmatprep.mubr.bf16.mxu1 %v3375_v14 }
 0x1cf   :  { %939 = vmatmul.mubr.bf16.gmra.mrb[28].mxu1 %v3382_v15 }
 0x1d0   :  { %948 = vmatprep.mubr.bf16.mxu1 %v3387_v16 }
 0x1d7   :  { %949 = vmatmul.mubr.bf16.gmra.mrb[32].mxu1 %v3394_v17 }
 0x1d8   :  { %958 = vmatprep.mubr.bf16.mxu1 %v3399_v18 }
 0x1df   :  { %959 = vmatmul.mubr.bf16.gmra.mrb[36].mxu1 %v3406_v19 }
 0x1e0   :  { %968 = vmatprep.mubr.bf16.mxu1 %v3411_v20 }
 0x1e7   :  { %969 = vmatmul.mubr.bf16.gmra.mrb[40].mxu1 %v3418_v21 }
 0x1e8   :  { %978 = vmatprep.mubr.bf16.mxu1 %v3423_v22 }
 0x1ef   :  { %979 = vmatmul.mubr.bf16.gmra.mrb[44].mxu1 %v3430_v23 }
 0x1f0   :  { %988 = vmatprep.mubr.bf16.mxu1 %v3435_v24 }
 0x1f7   :  { %989 = vmatmul.mubr.bf16.gmra.mrb[48].mxu1 %v3448_v27 }
 0x1f8   :  { %998 = vmatprep.mubr.bf16.mxu1 %v3453_v28 }
 0x1ff   :  { %999 = vmatmul.mubr.bf16.gmra.mrb[52].mxu1 %v3460_v29 }
 0x200   :  { %1008 = vmatprep.mubr.bf16.mxu1 %v3465_v30 }
 0x207   :  { %1009 = vmatmul.mubr.bf16.gmra.mrb[56].mxu1 %v3472_v31 }
 0x208   :  { %1018 = vmatprep.mubr.bf16.mxu1 %v3477_v32 }
 0x20f   :  { %1019 = vmatmul.mubr.bf16.gmra.mrb[60].mxu1 %v3484_v33 }
 0x210   :  { %1586 = vmatprep.mubr.bf16.mxu1 %v3202_v1 }
 0x26a   :  { %v870_v1 = vpop.f32.mrb[0].mxu1 }
 0x26b   :  { %v871_v41 = vadd.f32 %v870_v1, %v3498_v39  ;;  %v872_v42 = vpop.f32.mrb[1].mxu1 }
 0x26c   :  { %v873_v43 = vadd.f32 %v872_v42, %v3502_v40  ;;  %v874_v45 = vpop.f32.mrb[2].mxu1 }
 0x26d   :  { %v875_v47 = vadd.f32 %v874_v45, %v3498_v39  ;;  %v876_v48 = vpop.f32.mrb[3].mxu1  ;;  %v1029_v51 = vmax.f32 %v871_v41, 0.0 }
 0x26e   :  { %v877_v49 = vadd.f32 %v876_v48, %v3502_v40  ;;  %v1030_v54 = vmax.f32 %v873_v43, 0.0 }
 0x26f   :  { %v1031_v53 = vmax.f32 %v875_v47, 0.0 }
 0x270   :  { %v1032_v55 = vmax.f32 %v877_v49, 0.0 }
 0x271   :  { %v1093_v57 = vpack.c.bf16 %v1031_v53, %v1029_v51 }
 0x272   :  { %v1094_v59 = vpack.c.bf16 %v1032_v55, %v1030_v54  ;;  %v880_v60 = vpop.f32.mrb[4].mxu1 }
 0x273   :  { %v881_v61 = vadd.f32 %v880_v60, %v3498_v39  ;;  %v882_v63 = vpop.f32.mrb[5].mxu1 }
 0x274   :  { %v883_v2 = vadd.f32 %v882_v63, %v3502_v40  ;;  %v884_v3 = vpop.f32.mrb[6].mxu1  ;;  %1349 = vmatprep.mubr.bf16.mxu0 %v1094_v59 }
 0x275   :  { %v885_v4 = vadd.f32 %v884_v3, %v3498_v39  ;;  %v886_v6 = vpop.f32.mrb[7].mxu1  ;;  %1350 = vmatmul.mubr.bf16.vlgmr.msra.gmra.mrb[64].mxu0 %v1093_v57  ;;  %v1033_v9 = vmax.f32 %v881_v61, 0.0 }
 0x276   :  { %v887_v8 = vadd.f32 %v886_v6, %v3502_v40  ;;  %v1034_v25 = vmax.f32 %v883_v2, 0.0 }
 0x277   :  { %v1035_v10 = vmax.f32 %v885_v4, 0.0 }
 0x278   :  { %v1036_v26 = vmax.f32 %v887_v8, 0.0 }
 0x279   :  { %v1095_v37 = vpack.c.bf16 %v1035_v10, %v1033_v9 }
 0x27a   :  { %v1096_v1 = vpack.c.bf16 %v1036_v26, %v1034_v25  ;;  %v890_v41 = vpop.f32.mrb[8].mxu1 }
 0x27b   :  { %v891_v42 = vadd.f32 %v890_v41, %v3498_v39  ;;  %v892_v43 = vpop.f32.mrb[9].mxu1 }
 0x27c   :  { %v893_v45 = vadd.f32 %v892_v43, %v3502_v40  ;;  %v894_v47 = vpop.f32.mrb[10].mxu1  ;;  %1359 = vmatprep.mubr.bf16.mxu0 %v1096_v1 }
 0x27d   :  { %v895_v48 = vadd.f32 %v894_v47, %v3498_v39  ;;  %v896_v49 = vpop.f32.mrb[11].mxu1  ;;  %1360 = vmatmul.mubr.bf16.gmra.mrb[68].mxu0 %v1095_v37  ;;  %v1037_v53 = vmax.f32 %v891_v42, 0.0 }
 0x27e   :  { %v897_v51 = vadd.f32 %v896_v49, %v3502_v40  ;;  %v1038_v55 = vmax.f32 %v893_v45, 0.0 }
 0x27f   :  { %v1039_v54 = vmax.f32 %v895_v48, 0.0 }
 0x280   :  { %v1040_v57 = vmax.f32 %v897_v51, 0.0 }
 0x281   :  { %v1097_v59 = vpack.c.bf16 %v1039_v54, %v1037_v53 }
 0x282   :  { %v1098_v60 = vpack.c.bf16 %v1040_v57, %v1038_v55  ;;  %v900_v61 = vpop.f32.mrb[12].mxu1 }
 0x283   :  { %v901_v63 = vadd.f32 %v900_v61, %v3498_v39  ;;  %v902_v2 = vpop.f32.mrb[13].mxu1 }
 0x284   :  { %v903_v3 = vadd.f32 %v902_v2, %v3502_v40  ;;  %v904_v4 = vpop.f32.mrb[14].mxu1  ;;  %1369 = vmatprep.mubr.bf16.mxu0 %v1098_v60 }
 0x285   :  { %v905_v6 = vadd.f32 %v904_v4, %v3498_v39  ;;  %v906_v8 = vpop.f32.mrb[15].mxu1  ;;  %1370 = vmatmul.mubr.bf16.gmra.mrb[72].mxu0 %v1097_v59  ;;  %v1041_v10 = vmax.f32 %v901_v63, 0.0 }
 0x286   :  { %v907_v9 = vadd.f32 %v906_v8, %v3502_v40  ;;  %v1042_v26 = vmax.f32 %v903_v3, 0.0 }
 0x287   :  { %v1043_v25 = vmax.f32 %v905_v6, 0.0 }
 0x288   :  { %v1044_v37 = vmax.f32 %v907_v9, 0.0 }
 0x289   :  { %v1099_v1 = vpack.c.bf16 %v1043_v25, %v1041_v10 }
 0x28a   :  { %v1100_v41 = vpack.c.bf16 %v1044_v37, %v1042_v26  ;;  %v910_v42 = vpop.f32.mrb[16].mxu1 }
 0x28b   :  { %v911_v43 = vadd.f32 %v910_v42, %v3498_v39  ;;  %v912_v45 = vpop.f32.mrb[17].mxu1 }
 0x28c   :  { %v913_v47 = vadd.f32 %v912_v45, %v3502_v40  ;;  %v914_v48 = vpop.f32.mrb[18].mxu1  ;;  %1379 = vmatprep.mubr.bf16.mxu0 %v1100_v41 }
 0x28d   :  { %v915_v49 = vadd.f32 %v914_v48, %v3498_v39  ;;  %v916_v51 = vpop.f32.mrb[19].mxu1  ;;  %1380 = vmatmul.mubr.bf16.gmra.mrb[76].mxu0 %v1099_v1  ;;  %v1045_v54 = vmax.f32 %v911_v43, 0.0 }
 0x28e   :  { %v917_v53 = vadd.f32 %v916_v51, %v3502_v40  ;;  %v1046_v57 = vmax.f32 %v913_v47, 0.0 }
 0x28f   :  { %v1047_v55 = vmax.f32 %v915_v49, 0.0 }
 0x290   :  { %v1048_v59 = vmax.f32 %v917_v53, 0.0 }
 0x291   :  { %v1101_v60 = vpack.c.bf16 %v1047_v55, %v1045_v54 }
 0x292   :  { %v1102_v61 = vpack.c.bf16 %v1048_v59, %v1046_v57  ;;  %v920_v63 = vpop.f32.mrb[20].mxu1 }
 0x293   :  { %v921_v2 = vadd.f32 %v920_v63, %v3498_v39  ;;  %v922_v3 = vpop.f32.mrb[21].mxu1 }
 0x294   :  { %v923_v4 = vadd.f32 %v922_v3, %v3502_v40  ;;  %v924_v6 = vpop.f32.mrb[22].mxu1  ;;  %1389 = vmatprep.mubr.bf16.mxu0 %v1102_v61 }
 0x295   :  { %v925_v8 = vadd.f32 %v924_v6, %v3498_v39  ;;  %v926_v9 = vpop.f32.mrb[23].mxu1  ;;  %1390 = vmatmul.mubr.bf16.gmra.mrb[80].mxu0 %v1101_v60  ;;  %v1049_v25 = vmax.f32 %v921_v2, 0.0 }
 0x296   :  { %v927_v10 = vadd.f32 %v926_v9, %v3502_v40  ;;  %v1050_v37 = vmax.f32 %v923_v4, 0.0 }
 0x297   :  { %v1051_v26 = vmax.f32 %v925_v8, 0.0 }
 0x298   :  { %v1052_v1 = vmax.f32 %v927_v10, 0.0 }
 0x299   :  { %v1103_v41 = vpack.c.bf16 %v1051_v26, %v1049_v25 }
 0x29a   :  { %v1104_v42 = vpack.c.bf16 %v1052_v1, %v1050_v37  ;;  %v930_v43 = vpop.f32.mrb[24].mxu1 }
 0x29b   :  { %v931_v45 = vadd.f32 %v930_v43, %v3498_v39  ;;  %v932_v47 = vpop.f32.mrb[25].mxu1 }
 0x29c   :  { %v933_v48 = vadd.f32 %v932_v47, %v3502_v40  ;;  %v934_v49 = vpop.f32.mrb[26].mxu1  ;;  %1399 = vmatprep.mubr.bf16.mxu0 %v1104_v42 }
 0x29d   :  { %v935_v51 = vadd.f32 %v934_v49, %v3498_v39  ;;  %v936_v53 = vpop.f32.mrb[27].mxu1  ;;  %1400 = vmatmul.mubr.bf16.gmra.mrb[84].mxu0 %v1103_v41  ;;  %v1053_v55 = vmax.f32 %v931_v45, 0.0 }
 0x29e   :  { %v937_v54 = vadd.f32 %v936_v53, %v3502_v40  ;;  %v1054_v59 = vmax.f32 %v933_v48, 0.0 }
 0x29f   :  { %v1055_v57 = vmax.f32 %v935_v51, 0.0 }
 0x2a0   :  { %v1056_v60 = vmax.f32 %v937_v54, 0.0 }
 0x2a1   :  { %v1105_v61 = vpack.c.bf16 %v1055_v57, %v1053_v55 }
 0x2a2   :  { %v1106_v63 = vpack.c.bf16 %v1056_v60, %v1054_v59  ;;  %v940_v2 = vpop.f32.mrb[28].mxu1 }
 0x2a3   :  { %v941_v3 = vadd.f32 %v940_v2, %v3498_v39  ;;  %v942_v4 = vpop.f32.mrb[29].mxu1 }
 0x2a4   :  { %v943_v6 = vadd.f32 %v942_v4, %v3502_v40  ;;  %v944_v8 = vpop.f32.mrb[30].mxu1  ;;  %1409 = vmatprep.mubr.bf16.mxu0 %v1106_v63 }
 0x2a5   :  { %v945_v9 = vadd.f32 %v944_v8, %v3498_v39  ;;  %v946_v10 = vpop.f32.mrb[31].mxu1  ;;  %1410 = vmatmul.mubr.bf16.gmra.mrb[88].mxu0 %v1105_v61  ;;  %v1057_v26 = vmax.f32 %v941_v3, 0.0 }
 0x2a6   :  { %v947_v25 = vadd.f32 %v946_v10, %v3502_v40  ;;  %v1058_v1 = vmax.f32 %v943_v6, 0.0 }
 0x2a7   :  { %v1059_v37 = vmax.f32 %v945_v9, 0.0 }
 0x2a8   :  { %v1060_v41 = vmax.f32 %v947_v25, 0.0 }
 0x2a9   :  { %v1107_v42 = vpack.c.bf16 %v1059_v37, %v1057_v26 }
 0x2aa   :  { %v1108_v43 = vpack.c.bf16 %v1060_v41, %v1058_v1  ;;  %v950_v45 = vpop.f32.mrb[32].mxu1 }
 0x2ab   :  { %v951_v47 = vadd.f32 %v950_v45, %v3498_v39  ;;  %v952_v48 = vpop.f32.mrb[33].mxu1 }
 0x2ac   :  { %v953_v49 = vadd.f32 %v952_v48, %v3502_v40  ;;  %v954_v51 = vpop.f32.mrb[34].mxu1  ;;  %1419 = vmatprep.mubr.bf16.mxu0 %v1108_v43 }
 0x2ad   :  { %v955_v53 = vadd.f32 %v954_v51, %v3498_v39  ;;  %v956_v54 = vpop.f32.mrb[35].mxu1  ;;  %1420 = vmatmul.mubr.bf16.gmra.mrb[92].mxu0 %v1107_v42  ;;  %v1061_v57 = vmax.f32 %v951_v47, 0.0 }
 0x2ae   :  { %v957_v55 = vadd.f32 %v956_v54, %v3502_v40  ;;  %v1062_v60 = vmax.f32 %v953_v49, 0.0 }
 0x2af   :  { %v1063_v59 = vmax.f32 %v955_v53, 0.0 }
 0x2b0   :  { %v1064_v61 = vmax.f32 %v957_v55, 0.0 }
 0x2b1   :  { %v1109_v63 = vpack.c.bf16 %v1063_v59, %v1061_v57 }
 0x2b2   :  { %v1110_v2 = vpack.c.bf16 %v1064_v61, %v1062_v60  ;;  %v960_v3 = vpop.f32.mrb[36].mxu1 }
 0x2b3   :  { %v961_v4 = vadd.f32 %v960_v3, %v3498_v39  ;;  %v962_v6 = vpop.f32.mrb[37].mxu1 }
 0x2b4   :  { %v963_v8 = vadd.f32 %v962_v6, %v3502_v40  ;;  %v964_v9 = vpop.f32.mrb[38].mxu1  ;;  %1429 = vmatprep.mubr.bf16.mxu0 %v1110_v2 }
 0x2b5   :  { %v965_v10 = vadd.f32 %v964_v9, %v3498_v39  ;;  %v966_v25 = vpop.f32.mrb[39].mxu1  ;;  %1430 = vmatmul.mubr.bf16.gmra.mrb[96].mxu0 %v1109_v63  ;;  %v1065_v37 = vmax.f32 %v961_v4, 0.0 }
 0x2b6   :  { %v967_v26 = vadd.f32 %v966_v25, %v3502_v40  ;;  %v1066_v41 = vmax.f32 %v963_v8, 0.0 }
 0x2b7   :  { %v1067_v1 = vmax.f32 %v965_v10, 0.0 }
 0x2b8   :  { %v1068_v42 = vmax.f32 %v967_v26, 0.0 }
 0x2b9   :  { %v1111_v43 = vpack.c.bf16 %v1067_v1, %v1065_v37 }
 0x2ba   :  { %v1112_v45 = vpack.c.bf16 %v1068_v42, %v1066_v41  ;;  %v970_v47 = vpop.f32.mrb[40].mxu1 }
 0x2bb   :  { %v971_v48 = vadd.f32 %v970_v47, %v3498_v39  ;;  %v972_v49 = vpop.f32.mrb[41].mxu1 }
 0x2bc   :  { %v973_v51 = vadd.f32 %v972_v49, %v3502_v40  ;;  %v974_v53 = vpop.f32.mrb[42].mxu1  ;;  %1439 = vmatprep.mubr.bf16.mxu0 %v1112_v45 }
 0x2bd   :  { %v975_v54 = vadd.f32 %v974_v53, %v3498_v39  ;;  %v976_v55 = vpop.f32.mrb[43].mxu1  ;;  %1440 = vmatmul.mubr.bf16.gmra.mrb[100].mxu0 %v1111_v43  ;;  %v1069_v59 = vmax.f32 %v971_v48, 0.0 }
 0x2be   :  { %v977_v57 = vadd.f32 %v976_v55, %v3502_v40  ;;  %v1070_v61 = vmax.f32 %v973_v51, 0.0 }
 0x2bf   :  { %v1071_v60 = vmax.f32 %v975_v54, 0.0 }
 0x2c0   :  { %v1072_v63 = vmax.f32 %v977_v57, 0.0 }
 0x2c1   :  { %v1113_v2 = vpack.c.bf16 %v1071_v60, %v1069_v59 }
 0x2c2   :  { %v1114_v3 = vpack.c.bf16 %v1072_v63, %v1070_v61  ;;  %v980_v4 = vpop.f32.mrb[44].mxu1 }
 0x2c3   :  { %v981_v6 = vadd.f32 %v980_v4, %v3498_v39  ;;  %v982_v8 = vpop.f32.mrb[45].mxu1 }
 0x2c4   :  { %v983_v9 = vadd.f32 %v982_v8, %v3502_v40  ;;  %v984_v10 = vpop.f32.mrb[46].mxu1  ;;  %1449 = vmatprep.mubr.bf16.mxu0 %v1114_v3 }
 0x2c5   :  { %v985_v25 = vadd.f32 %v984_v10, %v3498_v39  ;;  %v986_v26 = vpop.f32.mrb[47].mxu1  ;;  %1450 = vmatmul.mubr.bf16.gmra.mrb[104].mxu0 %v1113_v2  ;;  %v1073_v1 = vmax.f32 %v981_v6, 0.0 }
 0x2c6   :  { %v987_v37 = vadd.f32 %v986_v26, %v3502_v40  ;;  %v1074_v42 = vmax.f32 %v983_v9, 0.0 }
 0x2c7   :  { %v1075_v41 = vmax.f32 %v985_v25, 0.0 }
 0x2c8   :  { %v1076_v43 = vmax.f32 %v987_v37, 0.0 }
 0x2c9   :  { %v1115_v45 = vpack.c.bf16 %v1075_v41, %v1073_v1 }
 0x2ca   :  { %v1116_v47 = vpack.c.bf16 %v1076_v43, %v1074_v42  ;;  %v990_v48 = vpop.f32.mrb[48].mxu1 }
 0x2cb   :  { %v991_v49 = vadd.f32 %v990_v48, %v3498_v39  ;;  %v992_v51 = vpop.f32.mrb[49].mxu1 }
 0x2cc   :  { %v993_v53 = vadd.f32 %v992_v51, %v3502_v40  ;;  %v994_v54 = vpop.f32.mrb[50].mxu1  ;;  %1459 = vmatprep.mubr.bf16.mxu0 %v1116_v47 }
 0x2cd   :  { %v995_v55 = vadd.f32 %v994_v54, %v3498_v39  ;;  %v996_v57 = vpop.f32.mrb[51].mxu1  ;;  %1460 = vmatmul.mubr.bf16.gmra.mrb[108].mxu0 %v1115_v45  ;;  %v1077_v60 = vmax.f32 %v991_v49, 0.0 }
 0x2ce   :  { %v997_v59 = vadd.f32 %v996_v57, %v3502_v40  ;;  %v1078_v63 = vmax.f32 %v993_v53, 0.0 }
 0x2cf   :  { %v1079_v61 = vmax.f32 %v995_v55, 0.0 }
 0x2d0   :  { %v1080_v2 = vmax.f32 %v997_v59, 0.0 }
 0x2d1   :  { %v1117_v3 = vpack.c.bf16 %v1079_v61, %v1077_v60 }
 0x2d2   :  { %v1118_v4 = vpack.c.bf16 %v1080_v2, %v1078_v63  ;;  %v1000_v6 = vpop.f32.mrb[52].mxu1 }
 0x2d3   :  { %v1001_v8 = vadd.f32 %v1000_v6, %v3498_v39  ;;  %v1002_v9 = vpop.f32.mrb[53].mxu1 }
 0x2d4   :  { %v1003_v10 = vadd.f32 %v1002_v9, %v3502_v40  ;;  %v1004_v25 = vpop.f32.mrb[54].mxu1  ;;  %1469 = vmatprep.mubr.bf16.mxu0 %v1118_v4 }
 0x2d5   :  { %v1005_v26 = vadd.f32 %v1004_v25, %v3498_v39  ;;  %v1006_v37 = vpop.f32.mrb[55].mxu1  ;;  %1470 = vmatmul.mubr.bf16.gmra.mrb[112].mxu0 %v1117_v3  ;;  %v1081_v41 = vmax.f32 %v1001_v8, 0.0 }
 0x2d6   :  { %v1007_v1 = vadd.f32 %v1006_v37, %v3502_v40  ;;  %v1082_v43 = vmax.f32 %v1003_v10, 0.0 }
 0x2d7   :  { %v1083_v42 = vmax.f32 %v1005_v26, 0.0 }
 0x2d8   :  { %v1084_v45 = vmax.f32 %v1007_v1, 0.0 }
 0x2d9   :  { %v1119_v47 = vpack.c.bf16 %v1083_v42, %v1081_v41 }
 0x2da   :  { %v1120_v48 = vpack.c.bf16 %v1084_v45, %v1082_v43  ;;  %v1010_v49 = vpop.f32.mrb[56].mxu1 }
 0x2db   :  { %v1011_v51 = vadd.f32 %v1010_v49, %v3498_v39  ;;  %v1012_v53 = vpop.f32.mrb[57].mxu1 }
 0x2dc   :  { %v1013_v54 = vadd.f32 %v1012_v53, %v3502_v40  ;;  %v1014_v55 = vpop.f32.mrb[58].mxu1  ;;  %1479 = vmatprep.mubr.bf16.mxu0 %v1120_v48 }
 0x2dd   :  { %v1015_v57 = vadd.f32 %v1014_v55, %v3498_v39  ;;  %v1016_v59 = vpop.f32.mrb[59].mxu1  ;;  %1480 = vmatmul.mubr.bf16.gmra.mrb[116].mxu0 %v1119_v47  ;;  %v1085_v61 = vmax.f32 %v1011_v51, 0.0 }
 0x2de   :  { %v1017_v60 = vadd.f32 %v1016_v59, %v3502_v40  ;;  %v1086_v2 = vmax.f32 %v1013_v54, 0.0 }
 0x2df   :  { %v1087_v63 = vmax.f32 %v1015_v57, 0.0 }
 0x2e0   :  { %v1088_v3 = vmax.f32 %v1017_v60, 0.0 }
 0x2e1   :  { %v1121_v4 = vpack.c.bf16 %v1087_v63, %v1085_v61 }
 0x2e2   :  { %v1122_v6 = vpack.c.bf16 %v1088_v3, %v1086_v2  ;;  %v1020_v8 = vpop.f32.mrb[60].mxu1 }
 0x2e3   :  { %v1021_v9 = vadd.f32 %v1020_v8, %v3498_v39  ;;  %v1022_v10 = vpop.f32.mrb[61].mxu1 }
 0x2e4   :  { %v1023_v25 = vadd.f32 %v1022_v10, %v3502_v40  ;;  %v1024_v26 = vpop.f32.mrb[62].mxu1  ;;  %1489 = vmatprep.mubr.bf16.mxu0 %v1122_v6 }
 0x2e5   :  { %v1025_v37 = vadd.f32 %v1024_v26, %v3498_v39  ;;  %v1026_v1 = vpop.f32.mrb[63].mxu1  ;;  %1490 = vmatmul.mubr.bf16.gmra.mrb[120].mxu0 %v1121_v4  ;;  %v1089_v42 = vmax.f32 %v1021_v9, 0.0 }
 0x2e6   :  { %v1027_v41 = vadd.f32 %v1026_v1, %v3502_v40  ;;  %v1090_v45 = vmax.f32 %v1023_v25, 0.0 }
 0x2e7   :  { %v1091_v43 = vmax.f32 %v1025_v37, 0.0 }
 0x2e8   :  { %v1092_v47 = vmax.f32 %v1027_v41, 0.0 }
 0x2e9   :  { %v1123_v48 = vpack.c.bf16 %v1091_v43, %v1089_v42 }
 0x2ea   :  { %v1124_v49 = vpack.c.bf16 %v1092_v47, %v1090_v45 }
 0x2ec   :  { %1499 = vmatprep.mubr.bf16.mxu0 %v1124_v49 }
 0x2ed   :  { %1500 = vmatmul.mubr.bf16.gmra.mrb[124].mxu0 %v1123_v48 }
 0x348   :  { %v1351_v51 = vpop.f32.mrb[64].mxu0 }
 0x349   :  { %v1353_v53 = vpop.f32.mrb[65].mxu0 }
 0x34a   :  { %v1355_v54 = vpop.f32.mrb[66].mxu0 }
 0x34b   :  { %v1510_v55 = vpack.c.bf16 %v1355_v54, %v1351_v51  ;;  %v1357_v57 = vpop.f32.mrb[67].mxu0 }
 0x34c   :  { %v1511_v59 = vpack.c.bf16 %v1357_v57, %v1353_v53 }
 0x34e   :  { %1554 = vmatprep.subr.bf16.mxu1 %v1511_v59 }
 0x34f   :  { %1555 = vmatpush1.bf16.msra.mxu1 %v1510_v55 }
 0x350   :  { %v1361_v39 = vpop.f32.mrb[68].mxu0 }
 0x351   :  { %v1363_v60 = vpop.f32.mrb[69].mxu0 }
 0x352   :  { %v1365_v61 = vpop.f32.mrb[70].mxu0 }
 0x353   :  { %v1512_v40 = vpack.c.bf16 %v1365_v61, %v1361_v39  ;;  %v1367_v63 = vpop.f32.mrb[71].mxu0 }
 0x354   :  { %v1513_v2 = vpack.c.bf16 %v1367_v63, %v1363_v60 }
 0x356   :  { %1556 = vmatprep.subr.bf16.mxu1 %v1513_v2 }
 0x357   :  { %1557 = vmatpush1.bf16.msra.mxu1 %v1512_v40 }
 0x358   :  { %v1371_v3 = vpop.f32.mrb[72].mxu0 }
 0x359   :  { %v1373_v4 = vpop.f32.mrb[73].mxu0 }
 0x35a   :  { %v1375_v6 = vpop.f32.mrb[74].mxu0 }
 0x35b   :  { %v1514_v8 = vpack.c.bf16 %v1375_v6, %v1371_v3  ;;  %v1377_v9 = vpop.f32.mrb[75].mxu0 }
 0x35c   :  { %v1515_v10 = vpack.c.bf16 %v1377_v9, %v1373_v4 }
 0x35e   :  { %1558 = vmatprep.subr.bf16.mxu1 %v1515_v10 }
 0x35f   :  { %1559 = vmatpush1.bf16.msra.mxu1 %v1514_v8 }
 0x360   :  { %v1381_v25 = vpop.f32.mrb[76].mxu0 }
 0x361   :  { %v1383_v26 = vpop.f32.mrb[77].mxu0 }
 0x362   :  { %v1385_v37 = vpop.f32.mrb[78].mxu0 }
 0x363   :  { %v1516_v1 = vpack.c.bf16 %v1385_v37, %v1381_v25  ;;  %v1387_v41 = vpop.f32.mrb[79].mxu0 }
 0x364   :  { %v1517_v42 = vpack.c.bf16 %v1387_v41, %v1383_v26 }
 0x366   :  { %1560 = vmatprep.subr.bf16.mxu1 %v1517_v42 }
 0x367   :  { %1561 = vmatpush1.bf16.msra.mxu1 %v1516_v1 }
 0x368   :  { %v1391_v43 = vpop.f32.mrb[80].mxu0 }
 0x369   :  { %v1393_v45 = vpop.f32.mrb[81].mxu0 }
 0x36a   :  { %v1395_v47 = vpop.f32.mrb[82].mxu0 }
 0x36b   :  { %v1518_v48 = vpack.c.bf16 %v1395_v47, %v1391_v43  ;;  %v1397_v49 = vpop.f32.mrb[83].mxu0 }
 0x36c   :  { %v1519_v51 = vpack.c.bf16 %v1397_v49, %v1393_v45 }
 0x36e   :  { %1562 = vmatprep.subr.bf16.mxu1 %v1519_v51 }
 0x36f   :  { %1563 = vmatpush1.bf16.msra.mxu1 %v1518_v48 }
 0x370   :  { %v1401_v53 = vpop.f32.mrb[84].mxu0 }
 0x371   :  { %v1403_v54 = vpop.f32.mrb[85].mxu0 }
 0x372   :  { %v1405_v55 = vpop.f32.mrb[86].mxu0 }
 0x373   :  { %v1520_v57 = vpack.c.bf16 %v1405_v55, %v1401_v53  ;;  %v1407_v59 = vpop.f32.mrb[87].mxu0 }
 0x374   :  { %v1521_v39 = vpack.c.bf16 %v1407_v59, %v1403_v54 }
 0x376   :  { %1564 = vmatprep.subr.bf16.mxu1 %v1521_v39 }
 0x377   :  { %1565 = vmatpush1.bf16.msra.mxu1 %v1520_v57 }
 0x378   :  { %v1411_v60 = vpop.f32.mrb[88].mxu0 }
 0x379   :  { %v1413_v61 = vpop.f32.mrb[89].mxu0 }
 0x37a   :  { %v1415_v40 = vpop.f32.mrb[90].mxu0 }
 0x37b   :  { %v1522_v63 = vpack.c.bf16 %v1415_v40, %v1411_v60  ;;  %v1417_v2 = vpop.f32.mrb[91].mxu0 }
 0x37c   :  { %v1523_v3 = vpack.c.bf16 %v1417_v2, %v1413_v61 }
 0x37e   :  { %1566 = vmatprep.subr.bf16.mxu1 %v1523_v3 }
 0x37f   :  { %1567 = vmatpush1.bf16.msra.mxu1 %v1522_v63 }
 0x380   :  { %v1421_v4 = vpop.f32.mrb[92].mxu0 }
 0x381   :  { %v1423_v6 = vpop.f32.mrb[93].mxu0 }
 0x382   :  { %v1425_v8 = vpop.f32.mrb[94].mxu0 }
 0x383   :  { %v1524_v9 = vpack.c.bf16 %v1425_v8, %v1421_v4  ;;  %v1427_v10 = vpop.f32.mrb[95].mxu0 }
 0x384   :  { %v1525_v25 = vpack.c.bf16 %v1427_v10, %v1423_v6 }
 0x386   :  { %1568 = vmatprep.subr.bf16.mxu1 %v1525_v25 }
 0x387   :  { %1569 = vmatpush1.bf16.msra.mxu1 %v1524_v9 }
 0x388   :  { %v1431_v26 = vpop.f32.mrb[96].mxu0 }
 0x389   :  { %v1433_v37 = vpop.f32.mrb[97].mxu0 }
 0x38a   :  { %v1435_v1 = vpop.f32.mrb[98].mxu0 }
 0x38b   :  { %v1526_v41 = vpack.c.bf16 %v1435_v1, %v1431_v26  ;;  %v1437_v42 = vpop.f32.mrb[99].mxu0 }
 0x38c   :  { %v1527_v43 = vpack.c.bf16 %v1437_v42, %v1433_v37 }
 0x38e   :  { %1570 = vmatprep.subr.bf16.mxu1 %v1527_v43 }
 0x38f   :  { %1571 = vmatpush1.bf16.msra.mxu1 %v1526_v41 }
 0x390   :  { %v1441_v45 = vpop.f32.mrb[100].mxu0 }
 0x391   :  { %v1443_v47 = vpop.f32.mrb[101].mxu0 }
 0x392   :  { %v1445_v48 = vpop.f32.mrb[102].mxu0 }
 0x393   :  { %v1528_v49 = vpack.c.bf16 %v1445_v48, %v1441_v45  ;;  %v1447_v51 = vpop.f32.mrb[103].mxu0 }
 0x394   :  { %v1529_v53 = vpack.c.bf16 %v1447_v51, %v1443_v47 }
 0x396   :  { %1572 = vmatprep.subr.bf16.mxu1 %v1529_v53 }
 0x397   :  { %1573 = vmatpush1.bf16.msra.mxu1 %v1528_v49 }
 0x398   :  { %v1451_v54 = vpop.f32.mrb[104].mxu0 }
 0x399   :  { %v1453_v55 = vpop.f32.mrb[105].mxu0 }
 0x39a   :  { %v1455_v57 = vpop.f32.mrb[106].mxu0 }
 0x39b   :  { %v1530_v59 = vpack.c.bf16 %v1455_v57, %v1451_v54  ;;  %v1457_v39 = vpop.f32.mrb[107].mxu0 }
 0x39c   :  { %v1531_v60 = vpack.c.bf16 %v1457_v39, %v1453_v55 }
 0x39e   :  { %1574 = vmatprep.subr.bf16.mxu1 %v1531_v60 }
 0x39f   :  { %1575 = vmatpush1.bf16.msra.mxu1 %v1530_v59 }
 0x3a0   :  { %v1461_v61 = vpop.f32.mrb[108].mxu0 }
 0x3a1   :  { %v1463_v40 = vpop.f32.mrb[109].mxu0 }
 0x3a2   :  { %v1465_v63 = vpop.f32.mrb[110].mxu0 }
 0x3a3   :  { %v1532_v2 = vpack.c.bf16 %v1465_v63, %v1461_v61  ;;  %v1467_v3 = vpop.f32.mrb[111].mxu0 }
 0x3a4   :  { %v1533_v4 = vpack.c.bf16 %v1467_v3, %v1463_v40 }
 0x3a6   :  { %1576 = vmatprep.subr.bf16.mxu1 %v1533_v4 }
 0x3a7   :  { %1577 = vmatpush1.bf16.msra.mxu1 %v1532_v2 }
 0x3a8   :  { %v1471_v6 = vpop.f32.mrb[112].mxu0 }
 0x3a9   :  { %v1473_v8 = vpop.f32.mrb[113].mxu0 }
 0x3aa   :  { %v1475_v9 = vpop.f32.mrb[114].mxu0 }
 0x3ab   :  { %v1534_v10 = vpack.c.bf16 %v1475_v9, %v1471_v6  ;;  %v1477_v25 = vpop.f32.mrb[115].mxu0 }
 0x3ac   :  { %v1535_v26 = vpack.c.bf16 %v1477_v25, %v1473_v8 }
 0x3ae   :  { %1578 = vmatprep.subr.bf16.mxu1 %v1535_v26 }
 0x3af   :  { %1579 = vmatpush1.bf16.msra.mxu1 %v1534_v10 }
 0x3b0   :  { %v1481_v37 = vpop.f32.mrb[116].mxu0 }
 0x3b1   :  { %v1483_v1 = vpop.f32.mrb[117].mxu0 }
 0x3b2   :  { %v1485_v41 = vpop.f32.mrb[118].mxu0 }
 0x3b3   :  { %v1536_v42 = vpack.c.bf16 %v1485_v41, %v1481_v37  ;;  %v1487_v43 = vpop.f32.mrb[119].mxu0 }
 0x3b4   :  { %v1537_v45 = vpack.c.bf16 %v1487_v43, %v1483_v1 }
 0x3b6   :  { %1580 = vmatprep.subr.bf16.mxu1 %v1537_v45 }
 0x3b7   :  { %1581 = vmatpush1.bf16.msra.mxu1 %v1536_v42 }
 0x3b8   :  { %v1491_v47 = vpop.f32.mrb[120].mxu0 }
 0x3b9   :  { %v1493_v48 = vpop.f32.mrb[121].mxu0 }
 0x3ba   :  { %v1495_v49 = vpop.f32.mrb[122].mxu0 }
 0x3bb   :  { %v1538_v51 = vpack.c.bf16 %v1495_v49, %v1491_v47  ;;  %v1497_v53 = vpop.f32.mrb[123].mxu0 }
 0x3bc   :  { %v1539_v54 = vpack.c.bf16 %v1497_v53, %v1493_v48 }
 0x3be   :  { %1582 = vmatprep.subr.bf16.mxu1 %v1539_v54 }
 0x3bf   :  { %1583 = vmatpush1.bf16.msra.mxu1 %v1538_v51 }
 0x3c0   :  { %v1501_v55 = vpop.f32.mrb[124].mxu0 }
 0x3c1   :  { %v1503_v57 = vpop.f32.mrb[125].mxu0 }
 0x3c2   :  { %v1505_v59 = vpop.f32.mrb[126].mxu0 }
 0x3c3   :  { %v1540_v39 = vpack.c.bf16 %v1505_v59, %v1501_v55  ;;  %v1507_v60 = vpop.f32.mrb[127].mxu0 }
 0x3c4   :  { %v1541_v61 = vpack.c.bf16 %v1507_v60, %v1503_v57 }
 0x3c6   :  { %1584 = vmatprep.subr.bf16.mxu1 %v1541_v61 }
 0x3c7   :  { %1585 = vmatpush1.bf16.msra.mxu1 %v1540_v39 }
 0x3ca   :  { %1587 = vmatmul.mubr.bf16.vlgmr.msra.gmra.mrb[64].mxu1 %v3238_v44  ;;  %v3602_v44 = vld [vmem:[%s4551_s5] sm:$0x3] }
 0x3cb   :  { %1596 = vmatprep.mubr.bf16.mxu1 %v3246_v46  ;;  %v3607_v46 = vrot.slane %v3602_v44, %v668_v36 }
 0x3d2   :  { %1597 = vmatmul.mubr.bf16.gmra.mrb[68].mxu1 %v3262_v50  ;;  %v3610_v50 = vand.u32 127, %v666_v34 }
 0x3d3   :  { %1606 = vmatprep.mubr.bf16.mxu1 %v3270_v52 }
 0x3d4   :  { %vm1814_vm0 = vcmp.lt.s32.totalorder %v3610_v50, 32 }
 0x3da   :  { %1607 = vmatmul.mubr.bf16.gmra.mrb[72].mxu1 %v3286_v56 }
 0x3db   :  { %1616 = vmatprep.mubr.bf16.mxu1 %v3294_v58 }
 0x3e2   :  { %1617 = vmatmul.mubr.bf16.gmra.mrb[76].mxu1 %v3310_v62 }
 0x3e3   :  { %1626 = vmatprep.mubr.bf16.mxu1 %v3318_v0 }
 0x3ea   :  { %1627 = vmatmul.mubr.bf16.gmra.mrb[80].mxu1 %v3334_v5 }
 0x3eb   :  { %1636 = vmatprep.mubr.bf16.mxu1 %v3342_v7 }
 0x3f2   :  { %1637 = vmatmul.mubr.bf16.gmra.mrb[84].mxu1 %v3358_v11 }
 0x3f3   :  { %1646 = vmatprep.mubr.bf16.mxu1 %v3363_v12 }
 0x3fa   :  { %1647 = vmatmul.mubr.bf16.gmra.mrb[88].mxu1 %v3370_v13 }
 0x3fb   :  { %1656 = vmatprep.mubr.bf16.mxu1 %v3375_v14 }
 0x402   :  { %1657 = vmatmul.mubr.bf16.gmra.mrb[92].mxu1 %v3382_v15 }
 0x403   :  { %1666 = vmatprep.mubr.bf16.mxu1 %v3387_v16 }
 0x40a   :  { %1667 = vmatmul.mubr.bf16.gmra.mrb[96].mxu1 %v3394_v17 }
 0x40b   :  { %1676 = vmatprep.mubr.bf16.mxu1 %v3399_v18 }
 0x412   :  { %1677 = vmatmul.mubr.bf16.gmra.mrb[100].mxu1 %v3406_v19 }
 0x413   :  { %1686 = vmatprep.mubr.bf16.mxu1 %v3411_v20 }
 0x41a   :  { %1687 = vmatmul.mubr.bf16.gmra.mrb[104].mxu1 %v3418_v21 }
 0x41b   :  { %1696 = vmatprep.mubr.bf16.mxu1 %v3423_v22 }
 0x422   :  { %1697 = vmatmul.mubr.bf16.gmra.mrb[108].mxu1 %v3430_v23 }
 0x423   :  { %1706 = vmatprep.mubr.bf16.mxu1 %v3435_v24 }
 0x42a   :  { %1707 = vmatmul.mubr.bf16.gmra.mrb[112].mxu1 %v3448_v27 }
 0x42b   :  { %1716 = vmatprep.mubr.bf16.mxu1 %v3453_v28 }
 0x432   :  { %1717 = vmatmul.mubr.bf16.gmra.mrb[116].mxu1 %v3460_v29 }
 0x433   :  { %1726 = vmatprep.mubr.bf16.mxu1 %v3465_v30 }
 0x43a   :  { %1727 = vmatmul.mubr.bf16.gmra.mrb[120].mxu1 %v3472_v31 }
 0x43b   :  { %1736 = vmatprep.mubr.bf16.mxu1 %v3477_v32 }
 0x442   :  { %1737 = vmatmul.mubr.bf16.gmra.mrb[124].mxu1 %v3484_v33 }
 0x49d   :  { %v1588_v52 = vpop.f32.mrb[64].mxu1 }
 0x49e   :  { %v3613_v56 = vadd.f32 %v1588_v52, %v3607_v46  ;;  %v3615_v58 = vpop.f32.mrb[65].mxu1 }
 0x49f   :  { %v1592_v62 = vpop.f32.mrb[66].mxu1 }
 0x4a0   :  { %v4576_v0 = vmax.f32 %v3613_v56, 0.0  ;;  %v3620_v5 = vadd.f32 %v1592_v62, %v3607_v46  ;;  %v3622_v7 = vpop.f32.mrb[67].mxu1 }
 0x4a2   :  { %v4573_v11 = vmax.f32 %v3620_v5, 0.0  ;;  %v1816_v12 = vsel %vm1814_vm0, %v4576_v0, -inf }
 0x4a3   :  { %1881 = vmax.xlane.f32.xlu0 %v1816_v12 }
 0x4a4   :  { %v1818_v15 = vsel %vm1814_vm0, %v4573_v11, -inf }
 0x4a5   :  { %v1598_v13 = vpop.f32.mrb[68].mxu1 }
 0x4a6   :  { %v3630_v14 = vadd.f32 %v1598_v13, %v3607_v46  ;;  %v3636_v16 = vpop.f32.mrb[69].mxu1 }
 0x4a7   :  { %1884 = vmax.xlane.f32.xlu0 %v1818_v15  ;;  %v1602_v17 = vpop.f32.mrb[70].mxu1 }
 0x4a8   :  { %v4572_v18 = vmax.f32 %v3630_v14, 0.0  ;;  %v3640_v19 = vadd.f32 %v1602_v17, %v3607_v46  ;;  %v3642_v20 = vpop.f32.mrb[71].mxu1 }
 0x4aa   :  { %v4571_v21 = vmax.f32 %v3640_v19, 0.0  ;;  %v1820_v22 = vsel %vm1814_vm0, %v4572_v18, -inf }
 0x4ab   :  { %1887 = vmax.xlane.f32.xlu1 %v1820_v22 }
 0x4ac   :  { %v1822_v28 = vsel %vm1814_vm0, %v4571_v21, -inf }
 0x4ad   :  { %v1608_v23 = vpop.f32.mrb[72].mxu1 }
 0x4ae   :  { %v3650_v24 = vadd.f32 %v1608_v23, %v3607_v46  ;;  %v3652_v27 = vpop.f32.mrb[73].mxu1 }
 0x4af   :  { %v1612_v29 = vpop.f32.mrb[74].mxu1  ;;  %1890 = vmax.xlane.f32.xlu1 %v1822_v28 }
 0x4b0   :  { %v4570_v30 = vmax.f32 %v3650_v24, 0.0  ;;  %v3660_v31 = vadd.f32 %v1612_v29, %v3607_v46  ;;  %v3662_v32 = vpop.f32.mrb[75].mxu1 }
 0x4b2   :  { %v4567_v33 = vmax.f32 %v3660_v31, 0.0  ;;  %v1824_v34 = vsel %vm1814_vm0, %v4570_v30, -inf }
 0x4b3   :  { %1893 = vmax.xlane.f32.xlu0 %v1824_v34 }
 0x4b4   :  { %v1826_v36 = vsel %vm1814_vm0, %v4567_v33, -inf }
 0x4b5   :  { %v1618_v40 = vpop.f32.mrb[76].mxu1  ;;  %1896 = vmax.xlane.f32.xlu1 %v1826_v36 }
 0x4b6   :  { %v3674_v63 = vadd.f32 %v1618_v40, %v3607_v46  ;;  %v3676_v2 = vpop.f32.mrb[77].mxu1 }
 0x4b7   :  { %v1622_v3 = vpop.f32.mrb[78].mxu1 }
 0x4b8   :  { %v4566_v4 = vmax.f32 %v3674_v63, 0.0  ;;  %v3680_v6 = vadd.f32 %v1622_v3, %v3607_v46  ;;  %v3682_v8 = vpop.f32.mrb[79].mxu1 }
 0x4ba   :  { %v4565_v9 = vmax.f32 %v3680_v6, 0.0  ;;  %v1828_v10 = vsel %vm1814_vm0, %v4566_v4, -inf }
 0x4bb   :  { %1899 = vmax.xlane.f32.xlu0 %v1828_v10 }
 0x4bc   :  { %v1830_v25 = vsel %vm1814_vm0, %v4565_v9, -inf }
 0x4bd   :  { %v1628_v26 = vpop.f32.mrb[80].mxu1  ;;  %1902 = vmax.xlane.f32.xlu1 %v1830_v25 }
 0x4be   :  { %v3694_v37 = vadd.f32 %v1628_v26, %v3607_v46  ;;  %v3696_v1 = vpop.f32.mrb[81].mxu1 }
 0x4bf   :  { %v1632_v41 = vpop.f32.mrb[82].mxu1 }
 0x4c0   :  { %v4564_v42 = vmax.f32 %v3694_v37, 0.0  ;;  %v3700_v43 = vadd.f32 %v1632_v41, %v3607_v46  ;;  %v3702_v45 = vpop.f32.mrb[83].mxu1 }
 0x4c2   :  { %v4561_v47 = vmax.f32 %v3700_v43, 0.0  ;;  %v1832_v48 = vsel %vm1814_vm0, %v4564_v42, -inf }
 0x4c3   :  { %1905 = vmax.xlane.f32.xlu0 %v1832_v48 }
 0x4c4   :  { %v1834_v49 = vsel %vm1814_vm0, %v4561_v47, -inf }
 0x4c5   :  { %v1638_v51 = vpop.f32.mrb[84].mxu1  ;;  %1908 = vmax.xlane.f32.xlu1 %v1834_v49 }
 0x4c6   :  { %v3714_v53 = vadd.f32 %v1638_v51, %v3607_v46  ;;  %v3716_v54 = vpop.f32.mrb[85].mxu1 }
 0x4c7   :  { %v1642_v55 = vpop.f32.mrb[86].mxu1 }
 0x4c8   :  { %v4560_v57 = vmax.f32 %v3714_v53, 0.0  ;;  %v3720_v59 = vadd.f32 %v1642_v55, %v3607_v46  ;;  %v3722_v39 = vpop.f32.mrb[87].mxu1 }
 0x4ca   :  { %v4559_v60 = vmax.f32 %v3720_v59, 0.0  ;;  %v1836_v61 = vsel %vm1814_vm0, %v4560_v57, -inf }
 0x4cb   :  { %1911 = vmax.xlane.f32.xlu0 %v1836_v61 }
 0x4cc   :  { %v1838_v52 = vsel %vm1814_vm0, %v4559_v60, -inf }
 0x4cd   :  { %v1648_v62 = vpop.f32.mrb[88].mxu1  ;;  %1914 = vmax.xlane.f32.xlu1 %v1838_v52 }
 0x4ce   :  { %v3734_v12 = vadd.f32 %v1648_v62, %v3607_v46  ;;  %v3736_v13 = vpop.f32.mrb[89].mxu1 }
 0x4cf   :  { %v1652_v15 = vpop.f32.mrb[90].mxu1 }
 0x4d0   :  { %v4558_v17 = vmax.f32 %v3734_v12, 0.0  ;;  %v3740_v22 = vadd.f32 %v1652_v15, %v3607_v46  ;;  %v3742_v23 = vpop.f32.mrb[91].mxu1 }
 0x4d2   :  { %v4555_v28 = vmax.f32 %v3740_v22, 0.0  ;;  %v1840_v29 = vsel %vm1814_vm0, %v4558_v17, -inf }
 0x4d3   :  { %1917 = vmax.xlane.f32.xlu0 %v1840_v29 }
 0x4d4   :  { %v1842_v34 = vsel %vm1814_vm0, %v4555_v28, -inf }
 0x4d5   :  { %v1658_v36 = vpop.f32.mrb[92].mxu1  ;;  %1920 = vmax.xlane.f32.xlu1 %v1842_v34 }
 0x4d6   :  { %v3754_v40 = vadd.f32 %v1658_v36, %v3607_v46  ;;  %v3756_v3 = vpop.f32.mrb[93].mxu1 }
 0x4d7   :  { %v1662_v10 = vpop.f32.mrb[94].mxu1 }
 0x4d8   :  { %v4554_v25 = vmax.f32 %v3754_v40, 0.0  ;;  %v3760_v26 = vadd.f32 %v1662_v10, %v3607_v46  ;;  %v3762_v41 = vpop.f32.mrb[95].mxu1 }
 0x4da   :  { %v4553_v48 = vmax.f32 %v3760_v26, 0.0  ;;  %v1844_v49 = vsel %vm1814_vm0, %v4554_v25, -inf }
 0x4db   :  { %1923 = vmax.xlane.f32.xlu0 %v1844_v49 }
 0x4dc   :  { %v1846_v51 = vsel %vm1814_vm0, %v4553_v48, -inf }
 0x4dd   :  { %v1668_v55 = vpop.f32.mrb[96].mxu1  ;;  %1926 = vmax.xlane.f32.xlu1 %v1846_v51 }
 0x4de   :  { %v3774_v61 = vadd.f32 %v1668_v55, %v3607_v46  ;;  %v3776_v52 = vpop.f32.mrb[97].mxu1 }
 0x4df   :  { %v1672_v62 = vpop.f32.mrb[98].mxu1 }
 0x4e0   :  { %v4556_v15 = vmax.f32 %v3774_v61, 0.0  ;;  %v3780_v29 = vadd.f32 %v1672_v62, %v3607_v46  ;;  %v3782_v34 = vpop.f32.mrb[99].mxu1 }
 0x4e2   :  { %v4557_v36 = vmax.f32 %v3780_v29, 0.0  ;;  %v1848_v10 = vsel %vm1814_vm0, %v4556_v15, -inf }
 0x4e3   :  { %1929 = vmax.xlane.f32.xlu0 %v1848_v10 }
 0x4e4   :  { %v1850_v49 = vsel %vm1814_vm0, %v4557_v36, -inf }
 0x4e5   :  { %v1678_v51 = vpop.f32.mrb[100].mxu1  ;;  %1932 = vmax.xlane.f32.xlu1 %v1850_v49 }
 0x4e6   :  { %v3794_v55 = vadd.f32 %v1678_v51, %v3607_v46  ;;  %v3796_v62 = vpop.f32.mrb[101].mxu1 }
 0x4e7   :  { %v1682_v48 = vpop.f32.mrb[102].mxu1 }
 0x4e8   :  { %v4562_v25 = vmax.f32 %v3794_v55, 0.0  ;;  %v3800_v28 = vadd.f32 %v1682_v48, %v3607_v46  ;;  %v3802_v15 = vpop.f32.mrb[103].mxu1 }
 0x4ea   :  { %v4563_v10 = vmax.f32 %v3800_v28, 0.0  ;;  %v1852_v49 = vsel %vm1814_vm0, %v4562_v25, -inf }
 0x4eb   :  { %1935 = vmax.xlane.f32.xlu0 %v1852_v49 }
 0x4ec   :  { %v1854_v51 = vsel %vm1814_vm0, %v4563_v10, -inf }
 0x4ed   :  { %v1688_v36 = vpop.f32.mrb[104].mxu1  ;;  %1938 = vmax.xlane.f32.xlu1 %v1854_v51 }
 0x4ee   :  { %v3814_v48 = vadd.f32 %v1688_v36, %v3607_v46  ;;  %v3816_v17 = vpop.f32.mrb[105].mxu1 }
 0x4ef   :  { %v1692_v60 = vpop.f32.mrb[106].mxu1 }
 0x4f0   :  { %v4568_v57 = vmax.f32 %v3814_v48, 0.0  ;;  %v3820_v47 = vadd.f32 %v1692_v60, %v3607_v46  ;;  %v3822_v25 = vpop.f32.mrb[107].mxu1 }
 0x4f2   :  { %v4569_v49 = vmax.f32 %v3820_v47, 0.0  ;;  %v1856_v51 = vsel %vm1814_vm0, %v4568_v57, -inf }
 0x4f3   :  { %1941 = vmax.xlane.f32.xlu0 %v1856_v51 }
 0x4f4   :  { %v1858_v36 = vsel %vm1814_vm0, %v4569_v49, -inf }
 0x4f5   :  { %v1698_v10 = vpop.f32.mrb[108].mxu1  ;;  %1944 = vmax.xlane.f32.xlu1 %v1858_v36 }
 0x4f6   :  { %v3834_v60 = vadd.f32 %v1698_v10, %v3607_v46  ;;  %v3836_v42 = vpop.f32.mrb[109].mxu1 }
 0x4f7   :  { %v1702_v9 = vpop.f32.mrb[110].mxu1 }
 0x4f8   :  { %v4574_v4 = vmax.f32 %v3834_v60, 0.0  ;;  %v3840_v33 = vadd.f32 %v1702_v9, %v3607_v46  ;;  %v3842_v57 = vpop.f32.mrb[111].mxu1 }
 0x4fa   :  { %v4575_v51 = vmax.f32 %v3840_v33, 0.0  ;;  %v1860_v36 = vsel %vm1814_vm0, %v4574_v4, -inf }
 0x4fb   :  { %1947 = vmax.xlane.f32.xlu0 %v1860_v36 }
 0x4fc   :  { %v1862_v10 = vsel %vm1814_vm0, %v4575_v51, -inf }
 0x4fd   :  { %v1708_v49 = vpop.f32.mrb[112].mxu1  ;;  %1950 = vmax.xlane.f32.xlu1 %v1862_v10 }
 0x4fe   :  { %v3854_v9 = vadd.f32 %v1708_v49, %v3607_v46  ;;  %v3856_v30 = vpop.f32.mrb[113].mxu1 }
 0x4ff   :  { %v1712_v21 = vpop.f32.mrb[114].mxu1 }
 0x500   :  { %4599 = vst [vmem:[#allocation2_spill] sm:$0xff] %v3854_v9  ;;  %v4579_v18 = vmax.f32 %v3854_v9, 0.0  ;;  %v3860_v11 = vadd.f32 %v1712_v21, %v3607_v46  ;;  %v3862_v4 = vpop.f32.mrb[115].mxu1 }
 0x501   :  { %4601 = vst [vmem:[#allocation4_spill] sm:$0xff] %v3862_v4 }
 0x502   :  { %4600 = vst [vmem:[#allocation3_spill] sm:$0xff] %v3860_v11  ;;  %v4580_v36 = vmax.f32 %v3860_v11, 0.0  ;;  %v1864_v10 = vsel %vm1814_vm0, %v4579_v18, -inf }
 0x503   :  { %1953 = vmax.xlane.f32.xlu0 %v1864_v10 }
 0x504   :  { %v1866_v49 = vsel %vm1814_vm0, %v4580_v36, -inf }
 0x505   :  { %v1718_v51 = vpop.f32.mrb[116].mxu1  ;;  %1956 = vmax.xlane.f32.xlu1 %v1866_v49 }
 0x506   :  { %v3874_v21 = vadd.f32 %v1718_v51, %v3607_v46  ;;  %v3876_v0 = vpop.f32.mrb[117].mxu1 }
 0x507   :  { %4603 = vst [vmem:[#allocation6_spill] sm:$0xff] %v3876_v0  ;;  %v1722_v38 = vpop.f32.mrb[118].mxu1 }
 0x508   :  { %4602 = vst [vmem:[#allocation5_spill] sm:$0xff] %v3874_v21  ;;  %v4583_v4 = vmax.f32 %v3874_v21, 0.0  ;;  %v3880_v9 = vadd.f32 %v1722_v38, %v3607_v46  ;;  %v3882_v18 = vpop.f32.mrb[119].mxu1 }
 0x509   :  { %4605 = vst [vmem:[#allocation8_spill] sm:$0xff] %v3882_v18 }
 0x50a   :  { %4604 = vst [vmem:[#allocation7_spill] sm:$0xff] %v3880_v9  ;;  %v4584_v10 = vmax.f32 %v3880_v9, 0.0  ;;  %v1868_v49 = vsel %vm1814_vm0, %v4583_v4, -inf }
 0x50b   :  { %1959 = vmax.xlane.f32.xlu0 %v1868_v49 }
 0x50c   :  { %v1870_v51 = vsel %vm1814_vm0, %v4584_v10, -inf }
 0x50d   :  { %v1728_v36 = vpop.f32.mrb[120].mxu1  ;;  %1962 = vmax.xlane.f32.xlu1 %v1870_v51 }
 0x50e   :  { %v3894_v38 = vadd.f32 %v1728_v36, %v3607_v46  ;;  %v3896_v11 = vpop.f32.mrb[121].mxu1 }
 0x50f   :  { %4607 = vst [vmem:[#allocation10_spill] sm:$0xff] %v3896_v11  ;;  %v1732_v18 = vpop.f32.mrb[122].mxu1 }
 0x510   :  { %4606 = vst [vmem:[#allocation9_spill] sm:$0xff] %v3894_v38  ;;  %v4587_v0 = vmax.f32 %v3894_v38, 0.0  ;;  %v3900_v21 = vadd.f32 %v1732_v18, %v3607_v46  ;;  %v3902_v4 = vpop.f32.mrb[123].mxu1 }
 0x511   :  { %4609 = vst [vmem:[#allocation12_spill] sm:$0xff] %v3902_v4 }
 0x512   :  { %4608 = vst [vmem:[#allocation11_spill] sm:$0xff] %v3900_v21  ;;  %v4588_v49 = vmax.f32 %v3900_v21, 0.0  ;;  %v1872_v51 = vsel %vm1814_vm0, %v4587_v0, -inf }
 0x513   :  { %1965 = vmax.xlane.f32.xlu0 %v1872_v51 }
 0x514   :  { %v1874_v36 = vsel %vm1814_vm0, %v4588_v49, -inf  ;;  %v4613_v49 = vsub.s32 1, %v3489_v35 }
 0x515   :  { %v1738_v10 = vpop.f32.mrb[124].mxu1  ;;  %1968 = vmax.xlane.f32.xlu1 %v1874_v36 }
 0x516   :  { %v3914_v18 = vadd.f32 %v1738_v10, %v3607_v46  ;;  %v3916_v9 = vpop.f32.mrb[125].mxu1 }
 0x517   :  { %v1742_v4 = vpop.f32.mrb[126].mxu1 }
 0x518   :  { %4610 = vst [vmem:[#allocation13_spill] sm:$0xff] %v3914_v18  ;;  %v4590_v11 = vmax.f32 %v3914_v18, 0.0  ;;  %v3920_v38 = vadd.f32 %v1742_v4, %v3607_v46  ;;  %v3922_v0 = vpop.f32.mrb[127].mxu1  ;;  %v3936_v46 = vrot.slane %v3602_v44, %v4613_v49 }
 0x519   :  { %4612 = vst [vmem:[#allocation15_spill] sm:$0xff] %v3922_v0 }
 0x51a   :  { %4611 = vst [vmem:[#allocation14_spill] sm:$0xff] %v3920_v38  ;;  %v4593_v51 = vmax.f32 %v3920_v38, 0.0  ;;  %v1876_v36 = vsel %vm1814_vm0, %v4590_v11, -inf  ;;  %v1591_v4 = vadd.f32 %v3615_v58, %v3936_v46  ;;  %v1595_v18 = vadd.f32 %v3622_v7, %v3936_v46 }
 0x51b   :  { %1971 = vmax.xlane.f32.xlu0 %v1876_v36  ;;  %v4614_v36 = vmax.f32 %v3613_v56, 0.0  ;;  %v1601_v35 = vadd.f32 %v3636_v16, %v3936_v46  ;;  %v4615_v58 = vmax.f32 %v3620_v5, 0.0  ;;  %v1605_v56 = vadd.f32 %v3642_v20, %v3936_v46 }
 0x51c   :  { %v1878_v10 = vsel %vm1814_vm0, %v4593_v51, -inf  ;;  %v1748_v0 = vmax.f32 %v1591_v4, 0.0  ;;  %v4616_v16 = vmax.f32 %v3630_v14, 0.0  ;;  %v1611_v5 = vadd.f32 %v3652_v27, %v3936_v46 }
 0x51d   :  { %1974 = vmax.xlane.f32.xlu1 %v1878_v10  ;;  %v1750_v10 = vmax.f32 %v1595_v18, 0.0  ;;  %v1752_v51 = vmax.f32 %v1601_v35, 0.0  ;;  %v1615_v20 = vadd.f32 %v3662_v32, %v3936_v46 }
 0x530   :  { %v1882_v11 = vpop.xlane.xlu0 %1881 }
 0x531   :  { %v3944_v38 = vsub.f32 %v4614_v36, %v1882_v11  ;;  %v3946_v21 = vsub.f32 %v1748_v0, %v1882_v11 }
 0x533   :  { %v2040_v44 = vmul.f32 1.442695, %v3944_v38 }
 0x534   :  { %v1885_v49 = vpop.xlane.xlu0 %1884 }
 0x535   :  { %2844 = vpow2.f32 %v2040_v44  ;;  %v3953_v4 = vsub.f32 %v4615_v58, %v1885_v49  ;;  %v3955_v7 = vsub.f32 %v1750_v10, %v1885_v49  ;;  %v1754_v44 = vmax.f32 %v1605_v56, 0.0 }
 0x536   :  { %v4618_v49 = vmax.f32 %v3640_v19, 0.0 }
 0x537   :  { %v2044_v0 = vmul.f32 1.442695, %v3953_v4 }
 0x538   :  { %v1888_v11 = vpop.xlane.xlu1 %1887 }
 0x539   :  { %2846 = vpow2.f32 %v2044_v0  ;;  %v3962_v18 = vsub.f32 %v4616_v16, %v1888_v11  ;;  %v3964_v36 = vsub.f32 %v1752_v51, %v1888_v11  ;;  %v1756_v51 = vmax.f32 %v1611_v5, 0.0 }
 0x53a   :  { %v1758_v16 = vmax.f32 %v1615_v20, 0.0  ;;  %v1621_v5 = vadd.f32 %v3676_v2, %v3936_v46 }
 0x53b   :  { %4617 = vst [vmem:[#allocation16_spill] sm:$0xff] %v3964_v36  ;;  %v2048_v10 = vmul.f32 1.442695, %v3962_v18  ;;  %v4620_v36 = vmax.f32 %v3650_v24, 0.0 }
 0x53c   :  { %v1891_v35 = vpop.xlane.xlu1 %1890  ;;  %v1760_v2 = vmax.f32 %v1621_v5, 0.0 }
 0x53d   :  { %2848 = vpow2.f32 %v2048_v10  ;;  %v3973_v58 = vsub.f32 %v4618_v49, %v1891_v35  ;;  %v3975_v14 = vsub.f32 %v1754_v44, %v1891_v35  ;;  %v4621_v49 = vmax.f32 %v3660_v31, 0.0 }
 0x53f   :  { %4619 = vst [vmem:[#allocation17_spill] sm:$0xff] %v3975_v14  ;;  %v2845_v0 = vpop.eup %2844  ;;  %v2052_v56 = vmul.f32 1.442695, %v3973_v58 }
 0x540   :  { %v1894_v11 = vpop.xlane.xlu0 %1893  ;;  %v2168_v27 = vsel %vm1814_vm0, %v2845_v0, 0.0 }
 0x541   :  { %2850 = vpow2.f32 %v2052_v56  ;;  %v3982_v32 = vsub.f32 %v4620_v36, %v1894_v11  ;;  %v3984_v10 = vsub.f32 %v1756_v51, %v1894_v11  ;;  %2233 = vadd.xlane.f32.xlu0 %v2168_v27  ;;  %v1625_v36 = vadd.f32 %v3682_v8, %v3936_v46 }
 0x542   :  { %v1897_v19 = vpop.xlane.xlu1 %1896  ;;  %v4622_v27 = vmax.f32 %v3674_v63, 0.0 }
 0x543   :  { %v2847_v44 = vpop.eup %2846  ;;  %v2056_v35 = vmul.f32 1.442695, %v3982_v32  ;;  %v3991_v14 = vsub.f32 %v4621_v49, %v1897_v19  ;;  %v3993_v20 = vsub.f32 %v1758_v16, %v1897_v19  ;;  %v1762_v11 = vmax.f32 %v1625_v36, 0.0 }
 0x544   :  { %v2170_v24 = vsel %vm1814_vm0, %v2847_v44, 0.0  ;;  %v4623_v49 = vmax.f32 %v3680_v6, 0.0  ;;  %v1635_v36 = vadd.f32 %v3702_v45, %v3936_v46 }
 0x545   :  { %2852 = vpow2.f32 %v2056_v35  ;;  %v2060_v0 = vmul.f32 1.442695, %v3991_v14  ;;  %2236 = vadd.xlane.f32.xlu1 %v2170_v24  ;;  %v1631_v35 = vadd.f32 %v3696_v1, %v3936_v46 }
 0x547   :  { %v2849_v51 = vpop.eup %2848  ;;  %2854 = vpow2.f32 %v2060_v0  ;;  %v1764_v1 = vmax.f32 %v1631_v35, 0.0  ;;  %v1641_v35 = vadd.f32 %v3716_v54, %v3936_v46 }
 0x548   :  { %v1900_v56 = vpop.xlane.xlu0 %1899  ;;  %v2172_v31 = vsel %vm1814_vm0, %v2849_v51, 0.0 }
 0x549   :  { %v4004_v16 = vsub.f32 %v4622_v27, %v1900_v56  ;;  %v4006_v19 = vsub.f32 %v1760_v2, %v1900_v56  ;;  %2239 = vadd.xlane.f32.xlu0 %v2172_v31  ;;  %v4624_v27 = vmax.f32 %v3694_v37, 0.0  ;;  %v1645_v37 = vadd.f32 %v3722_v39, %v3936_v46 }
 0x54a   :  { %v1903_v8 = vpop.xlane.xlu1 %1902 }
 0x54b   :  { %v2851_v44 = vpop.eup %2850  ;;  %v2064_v5 = vmul.f32 1.442695, %v4004_v16  ;;  %v4013_v24 = vsub.f32 %v4623_v49, %v1903_v8  ;;  %v4015_v0 = vsub.f32 %v1762_v11, %v1903_v8  ;;  %v1766_v11 = vmax.f32 %v1635_v36, 0.0 }
 0x54c   :  { %v2174_v63 = vsel %vm1814_vm0, %v2851_v44, 0.0 }
 0x54d   :  { %2856 = vpow2.f32 %v2064_v5  ;;  %v2068_v51 = vmul.f32 1.442695, %v4013_v24  ;;  %2242 = vadd.xlane.f32.xlu1 %v2174_v63  ;;  %v4625_v63 = vmax.f32 %v3700_v43, 0.0  ;;  %v1770_v43 = vmax.f32 %v1645_v37, 0.0 }
 0x54f   :  { %v2853_v2 = vpop.eup %2852  ;;  %2858 = vpow2.f32 %v2068_v51 }
 0x550   :  { %v1906_v56 = vpop.xlane.xlu0 %1905  ;;  %v2176_v6 = vsel %vm1814_vm0, %v2853_v2, 0.0 }
 0x551   :  { %v2855_v31 = vpop.eup %2854  ;;  %v4026_v8 = vsub.f32 %v4624_v27, %v1906_v56  ;;  %v4028_v44 = vsub.f32 %v1764_v1, %v1906_v56  ;;  %2245 = vadd.xlane.f32.xlu0 %v2176_v6  ;;  %v1768_v56 = vmax.f32 %v1641_v35, 0.0  ;;  %v4626_v27 = vmax.f32 %v3714_v53, 0.0 }
 0x552   :  { %v1909_v45 = vpop.xlane.xlu1 %1908  ;;  %v2178_v5 = vsel %vm1814_vm0, %v2855_v31, 0.0  ;;  %v1651_v35 = vadd.f32 %v3736_v13, %v3936_v46  ;;  %v1655_v53 = vadd.f32 %v3742_v23, %v3936_v46 }
 0x553   :  { %v2072_v49 = vmul.f32 1.442695, %v4026_v8  ;;  %v4037_v51 = vsub.f32 %v4625_v63, %v1909_v45  ;;  %v4039_v36 = vsub.f32 %v1766_v11, %v1909_v45  ;;  %2248 = vadd.xlane.f32.xlu1 %v2178_v5  ;;  %v4627_v63 = vmax.f32 %v3720_v59, 0.0 }
 0x554   :  { %v1774_v59 = vmax.f32 %v1655_v53, 0.0 }
 0x555   :  { %2860 = vpow2.f32 %v2072_v49  ;;  %v2076_v2 = vmul.f32 1.442695, %v4037_v51 }
 0x557   :  { %v2857_v1 = vpop.eup %2856  ;;  %2862 = vpow2.f32 %v2076_v2 }
 0x558   :  { %v1912_v6 = vpop.xlane.xlu0 %1911  ;;  %v2180_v54 = vsel %vm1814_vm0, %v2857_v1, 0.0 }
 0x559   :  { %v2859_v31 = vpop.eup %2858  ;;  %v4048_v11 = vsub.f32 %v4626_v27, %v1912_v6  ;;  %v4050_v45 = vsub.f32 %v1768_v56, %v1912_v6  ;;  %2251 = vadd.xlane.f32.xlu0 %v2180_v54  ;;  %v1772_v6 = vmax.f32 %v1651_v35, 0.0  ;;  %v4628_v27 = vmax.f32 %v3734_v12, 0.0 }
 0x55a   :  { %v1915_v39 = vpop.xlane.xlu1 %1914  ;;  %v2182_v5 = vsel %vm1814_vm0, %v2859_v31, 0.0  ;;  %v1661_v35 = vadd.f32 %v3756_v3, %v3936_v46  ;;  %v1665_v12 = vadd.f32 %v3762_v41, %v3936_v46 }
 0x55b   :  { %v2080_v49 = vmul.f32 1.442695, %v4048_v11  ;;  %v4059_v2 = vsub.f32 %v4627_v63, %v1915_v39  ;;  %v4061_v37 = vsub.f32 %v1770_v43, %v1915_v39  ;;  %2254 = vadd.xlane.f32.xlu1 %v2182_v5  ;;  %v4629_v63 = vmax.f32 %v3740_v22, 0.0 }
 0x55c   :  { %v1778_v22 = vmax.f32 %v1665_v12, 0.0 }
 0x55d   :  { %2864 = vpow2.f32 %v2080_v49  ;;  %v2084_v1 = vmul.f32 1.442695, %v4059_v2 }
 0x55f   :  { %v2861_v56 = vpop.eup %2860  ;;  %2866 = vpow2.f32 %v2084_v1 }
 0x560   :  { %v1918_v54 = vpop.xlane.xlu0 %1917  ;;  %v2184_v13 = vsel %vm1814_vm0, %v2861_v56, 0.0 }
 0x561   :  { %v2863_v31 = vpop.eup %2862  ;;  %v4070_v43 = vsub.f32 %v4628_v27, %v1918_v54  ;;  %v4072_v39 = vsub.f32 %v1772_v6, %v1918_v54  ;;  %2257 = vadd.xlane.f32.xlu0 %v2184_v13  ;;  %v1776_v54 = vmax.f32 %v1661_v35, 0.0  ;;  %v4630_v27 = vmax.f32 %v3754_v40, 0.0 }
 0x562   :  { %v1921_v23 = vpop.xlane.xlu1 %1920  ;;  %v2186_v5 = vsel %vm1814_vm0, %v2863_v31, 0.0  ;;  %v1671_v35 = vadd.f32 %v3776_v52, %v3936_v46  ;;  %v1675_v40 = vadd.f32 %v3782_v34, %v3936_v46 }
 0x563   :  { %v2088_v49 = vmul.f32 1.442695, %v4070_v43  ;;  %v4081_v1 = vsub.f32 %v4629_v63, %v1921_v23  ;;  %v4083_v53 = vsub.f32 %v1774_v59, %v1921_v23  ;;  %2260 = vadd.xlane.f32.xlu1 %v2186_v5  ;;  %v4631_v63 = vmax.f32 %v3760_v26, 0.0 }
 0x564   :  { %v1782_v26 = vmax.f32 %v1675_v40, 0.0 }
 0x565   :  { %2868 = vpow2.f32 %v2088_v49  ;;  %v2092_v56 = vmul.f32 1.442695, %v4081_v1 }
 0x567   :  { %v2865_v6 = vpop.eup %2864  ;;  %2870 = vpow2.f32 %v2092_v56 }
 0x568   :  { %v1924_v13 = vpop.xlane.xlu0 %1923  ;;  %v2188_v3 = vsel %vm1814_vm0, %v2865_v6, 0.0 }
 0x569   :  { %v2867_v31 = vpop.eup %2866  ;;  %v4092_v59 = vsub.f32 %v4630_v27, %v1924_v13  ;;  %v4094_v23 = vsub.f32 %v1776_v54, %v1924_v13  ;;  %2263 = vadd.xlane.f32.xlu0 %v2188_v3  ;;  %v1780_v13 = vmax.f32 %v1671_v35, 0.0  ;;  %v4632_v27 = vmax.f32 %v3774_v61, 0.0 }
 0x56a   :  { %v1927_v41 = vpop.xlane.xlu1 %1926  ;;  %v2190_v5 = vsel %vm1814_vm0, %v2867_v31, 0.0  ;;  %v1681_v35 = vadd.f32 %v3796_v62, %v3936_v46  ;;  %v1685_v61 = vadd.f32 %v3802_v15, %v3936_v46 }
 0x56b   :  { %v2096_v49 = vmul.f32 1.442695, %v4092_v59  ;;  %v4103_v56 = vsub.f32 %v4631_v63, %v1927_v41  ;;  %v4105_v12 = vsub.f32 %v1778_v22, %v1927_v41  ;;  %2266 = vadd.xlane.f32.xlu1 %v2190_v5  ;;  %v4633_v63 = vmax.f32 %v3780_v29, 0.0 }
 0x56c   :  { %v1786_v29 = vmax.f32 %v1685_v61, 0.0 }
 0x56d   :  { %2872 = vpow2.f32 %v2096_v49  ;;  %v2100_v6 = vmul.f32 1.442695, %v4103_v56 }
 0x56f   :  { %v2869_v54 = vpop.eup %2868  ;;  %2874 = vpow2.f32 %v2100_v6 }
 0x570   :  { %v1930_v3 = vpop.xlane.xlu0 %1929  ;;  %v2192_v52 = vsel %vm1814_vm0, %v2869_v54, 0.0 }
 0x571   :  { %v2871_v31 = vpop.eup %2870  ;;  %v4114_v22 = vsub.f32 %v4632_v27, %v1930_v3  ;;  %v4116_v41 = vsub.f32 %v1780_v13, %v1930_v3  ;;  %2269 = vadd.xlane.f32.xlu0 %v2192_v52  ;;  %v1784_v3 = vmax.f32 %v1681_v35, 0.0  ;;  %v4634_v27 = vmax.f32 %v3794_v55, 0.0 }
 0x572   :  { %v1933_v34 = vpop.xlane.xlu1 %1932  ;;  %v2194_v5 = vsel %vm1814_vm0, %v2871_v31, 0.0  ;;  %v1691_v35 = vadd.f32 %v3816_v17, %v3936_v46  ;;  %v1695_v55 = vadd.f32 %v3822_v25, %v3936_v46 }
 0x573   :  { %v2104_v49 = vmul.f32 1.442695, %v4114_v22  ;;  %v4125_v6 = vsub.f32 %v4633_v63, %v1933_v34  ;;  %v4127_v40 = vsub.f32 %v1782_v26, %v1933_v34  ;;  %2272 = vadd.xlane.f32.xlu1 %v2194_v5  ;;  %v4635_v63 = vmax.f32 %v3800_v28, 0.0 }
 0x574   :  { %v1790_v28 = vmax.f32 %v1695_v55, 0.0 }
 0x575   :  { %2876 = vpow2.f32 %v2104_v49  ;;  %v2108_v54 = vmul.f32 1.442695, %v4125_v6 }
 0x577   :  { %v2873_v13 = vpop.eup %2872  ;;  %2878 = vpow2.f32 %v2108_v54 }
 0x578   :  { %v1936_v52 = vpop.xlane.xlu0 %1935  ;;  %v2196_v62 = vsel %vm1814_vm0, %v2873_v13, 0.0 }
 0x579   :  { %v2875_v31 = vpop.eup %2874  ;;  %v4136_v26 = vsub.f32 %v4634_v27, %v1936_v52  ;;  %v4138_v34 = vsub.f32 %v1784_v3, %v1936_v52  ;;  %2275 = vadd.xlane.f32.xlu0 %v2196_v62  ;;  %v1788_v52 = vmax.f32 %v1691_v35, 0.0  ;;  %v4636_v27 = vmax.f32 %v3814_v48, 0.0 }
 0x57a   :  { %v1939_v15 = vpop.xlane.xlu1 %1938  ;;  %v2198_v5 = vsel %vm1814_vm0, %v2875_v31, 0.0  ;;  %v1701_v35 = vadd.f32 %v3836_v42, %v3936_v46  ;;  %v1705_v48 = vadd.f32 %v3842_v57, %v3936_v46 }
 0x57b   :  { %v2112_v49 = vmul.f32 1.442695, %v4136_v26  ;;  %v4147_v54 = vsub.f32 %v4635_v63, %v1939_v15  ;;  %v4149_v61 = vsub.f32 %v1786_v29, %v1939_v15  ;;  %2278 = vadd.xlane.f32.xlu1 %v2198_v5  ;;  %v4637_v63 = vmax.f32 %v3820_v47, 0.0 }
 0x57c   :  { %v1794_v47 = vmax.f32 %v1705_v48, 0.0 }
 0x57d   :  { %2880 = vpow2.f32 %v2112_v49  ;;  %v2116_v13 = vmul.f32 1.442695, %v4147_v54 }
 0x57f   :  { %v2877_v3 = vpop.eup %2876  ;;  %2882 = vpow2.f32 %v2116_v13 }
 0x580   :  { %v1942_v62 = vpop.xlane.xlu0 %1941  ;;  %v2200_v17 = vsel %vm1814_vm0, %v2877_v3, 0.0 }
 0x581   :  { %v2879_v31 = vpop.eup %2878  ;;  %v4158_v29 = vsub.f32 %v4636_v27, %v1942_v62  ;;  %v4160_v15 = vsub.f32 %v1788_v52, %v1942_v62  ;;  %2281 = vadd.xlane.f32.xlu0 %v2200_v17  ;;  %v1792_v62 = vmax.f32 %v1701_v35, 0.0  ;;  %v4638_v27 = vmax.f32 %v3834_v60, 0.0  ;;  %v4643_v60 = vld [vmem:[#allocation4_spill] sm:$0xff] }
 0x582   :  { %v1945_v25 = vpop.xlane.xlu1 %1944  ;;  %v2202_v5 = vsel %vm1814_vm0, %v2879_v31, 0.0  ;;  %v1711_v35 = vadd.f32 %v3856_v30, %v3936_v46 }
 0x583   :  { %v2120_v49 = vmul.f32 1.442695, %v4158_v29  ;;  %v4169_v13 = vsub.f32 %v4637_v63, %v1945_v25  ;;  %v4171_v55 = vsub.f32 %v1790_v28, %v1945_v25  ;;  %2284 = vadd.xlane.f32.xlu1 %v2202_v5  ;;  %v4640_v63 = vmax.f32 %v3840_v33, 0.0 }
 0x585   :  { %2884 = vpow2.f32 %v2120_v49  ;;  %v2124_v3 = vmul.f32 1.442695, %v4169_v13 }
 0x587   :  { %v2881_v52 = vpop.eup %2880  ;;  %2886 = vpow2.f32 %v2124_v3 }
 0x588   :  { %v1948_v17 = vpop.xlane.xlu0 %1947  ;;  %v2204_v42 = vsel %vm1814_vm0, %v2881_v52, 0.0  ;;  %v1715_v52 = vadd.f32 %v4643_v60, %v3936_v46 }
 0x589   :  { %v2883_v31 = vpop.eup %2882  ;;  %v4180_v28 = vsub.f32 %v4638_v27, %v1948_v17  ;;  %v4182_v25 = vsub.f32 %v1792_v62, %v1948_v17  ;;  %2287 = vadd.xlane.f32.xlu0 %v2204_v42  ;;  %v1796_v42 = vmax.f32 %v1711_v35, 0.0  ;;  %v4648_v35 = vld [vmem:[#allocation6_spill] sm:$0xff] }
 0x58a   :  { %v1951_v57 = vpop.xlane.xlu1 %1950  ;;  %v2206_v5 = vsel %vm1814_vm0, %v2883_v31, 0.0  ;;  %v1798_v33 = vmax.f32 %v1715_v52, 0.0  ;;  %v1721_v60 = vadd.f32 %v4648_v35, %v3936_v46 }
 0x58b   :  { %4639 = vst [vmem:[#allocation18_spill] sm:$0xff] %v4182_v25  ;;  %v2128_v49 = vmul.f32 1.442695, %v4180_v28  ;;  %v4191_v3 = vsub.f32 %v4640_v63, %v1951_v57  ;;  %v4193_v48 = vsub.f32 %v1794_v47, %v1951_v57  ;;  %2290 = vadd.xlane.f32.xlu1 %v2206_v5  ;;  %v4644_v63 = vld [vmem:[#allocation2_spill] sm:$0xff] }
 0x58c   :  { %v4645_v25 = vmax.f32 %v4644_v63, 0.0 }
 0x58d   :  { %4641 = vst [vmem:[#allocation19_spill] sm:$0xff] %v4191_v3  ;;  %4642 = vst [vmem:[#allocation20_spill] sm:$0xff] %v4193_v48  ;;  %2888 = vpow2.f32 %v2128_v49  ;;  %v2132_v62 = vmul.f32 1.442695, %v4191_v3  ;;  %v4649_v48 = vld [vmem:[#allocation3_spill] sm:$0xff] }
 0x58f   :  { %v2885_v17 = vpop.eup %2884  ;;  %2890 = vpow2.f32 %v2132_v62 }
 0x590   :  { %v1954_v31 = vpop.xlane.xlu0 %1953  ;;  %v2208_v30 = vsel %vm1814_vm0, %v2885_v17, 0.0  ;;  %v4650_v17 = vmax.f32 %v4649_v48, 0.0 }
 0x591   :  { %v2887_v27 = vpop.eup %2886  ;;  %v4202_v47 = vsub.f32 %v4645_v25, %v1954_v31  ;;  %v4204_v57 = vsub.f32 %v1796_v42, %v1954_v31  ;;  %2293 = vadd.xlane.f32.xlu0 %v2208_v30  ;;  %v4653_v25 = vld [vmem:[#allocation8_spill] sm:$0xff] }
 0x592   :  { %v1957_v5 = vpop.xlane.xlu1 %1956  ;;  %v2210_v49 = vsel %vm1814_vm0, %v2887_v27, 0.0  ;;  %v1725_v42 = vadd.f32 %v4653_v25, %v3936_v46  ;;  %v1800_v27 = vmax.f32 %v1721_v60, 0.0  ;;  %v4658_v60 = vld [vmem:[#allocation10_spill] sm:$0xff] }
 0x593   :  { %4646 = vst [vmem:[#allocation4_spill] sm:$0xff] %v4202_v47  ;;  %4647 = vst [vmem:[#allocation2_spill] sm:$0xff] %v4204_v57  ;;  %v2136_v62 = vmul.f32 1.442695, %v4202_v47  ;;  %v4213_v3 = vsub.f32 %v4650_v17, %v1957_v5  ;;  %v4215_v52 = vsub.f32 %v1798_v33, %v1957_v5  ;;  %2296 = vadd.xlane.f32.xlu1 %v2210_v49  ;;  %v4654_v17 = vld [vmem:[#allocation5_spill] sm:$0xff] }
 0x594   :  { %v1802_v48 = vmax.f32 %v1725_v42, 0.0  ;;  %v4655_v47 = vmax.f32 %v4654_v17, 0.0  ;;  %v1731_v25 = vadd.f32 %v4658_v60, %v3936_v46 }
 0x595   :  { %4651 = vst [vmem:[#allocation6_spill] sm:$0xff] %v4213_v3  ;;  %4652 = vst [vmem:[#allocation3_spill] sm:$0xff] %v4215_v52  ;;  %2892 = vpow2.f32 %v2136_v62  ;;  %v2140_v31 = vmul.f32 1.442695, %v4213_v3  ;;  %v4659_v52 = vld [vmem:[#allocation7_spill] sm:$0xff] }
 0x597   :  { %v2889_v30 = vpop.eup %2888  ;;  %2894 = vpow2.f32 %v2140_v31 }
 0x598   :  { %v1960_v63 = vpop.xlane.xlu0 %1959  ;;  %v2212_v35 = vsel %vm1814_vm0, %v2889_v30, 0.0  ;;  %v4660_v30 = vmax.f32 %v4659_v52, 0.0 }
 0x599   :  { %v2891_v57 = vpop.eup %2890  ;;  %v4224_v33 = vsub.f32 %v4655_v47, %v1960_v63  ;;  %v4226_v5 = vsub.f32 %v1800_v27, %v1960_v63  ;;  %2299 = vadd.xlane.f32.xlu0 %v2212_v35  ;;  %v4662_v47 = vld [vmem:[#allocation12_spill] sm:$0xff] }
 0x59a   :  { %v1963_v49 = vpop.xlane.xlu1 %1962  ;;  %v2214_v62 = vsel %vm1814_vm0, %v2891_v57, 0.0  ;;  %v1735_v27 = vadd.f32 %v4662_v47, %v3936_v46  ;;  %v1804_v57 = vmax.f32 %v1731_v25, 0.0  ;;  %v1741_v25 = vadd.f32 %v3916_v9, %v3936_v46 }
 0x59b   :  { %4656 = vst [vmem:[#allocation8_spill] sm:$0xff] %v4224_v33  ;;  %4657 = vst [vmem:[#allocation5_spill] sm:$0xff] %v4226_v5  ;;  %v2144_v31 = vmul.f32 1.442695, %v4224_v33  ;;  %v4235_v3 = vsub.f32 %v4660_v30, %v1963_v49  ;;  %v4237_v42 = vsub.f32 %v1802_v48, %v1963_v49  ;;  %2302 = vadd.xlane.f32.xlu1 %v2214_v62  ;;  %v4663_v30 = vld [vmem:[#allocation9_spill] sm:$0xff] }
 0x59c   :  { %v1806_v52 = vmax.f32 %v1735_v27, 0.0  ;;  %v4664_v33 = vmax.f32 %v4663_v30, 0.0 }
 0x59d   :  { %4661 = vst [vmem:[#allocation10_spill] sm:$0xff] %v4237_v42  ;;  %2896 = vpow2.f32 %v2144_v31  ;;  %v2148_v63 = vmul.f32 1.442695, %v4235_v3 }
 0x59f   :  { %v2893_v35 = vpop.eup %2892  ;;  %2898 = vpow2.f32 %v2148_v63  ;;  %v4667_v63 = vld [vmem:[#allocation11_spill] sm:$0xff] }
 0x5a0   :  { %v1966_v17 = vpop.xlane.xlu0 %1965  ;;  %v2216_v60 = vsel %vm1814_vm0, %v2893_v35, 0.0  ;;  %v4668_v35 = vmax.f32 %v4667_v63, 0.0 }
 0x5a1   :  { %v2895_v5 = vpop.eup %2894  ;;  %v4246_v48 = vsub.f32 %v4664_v33, %v1966_v17  ;;  %v4248_v49 = vsub.f32 %v1804_v57, %v1966_v17  ;;  %2305 = vadd.xlane.f32.xlu0 %v2216_v60  ;;  %v4669_v33 = vld [vmem:[#allocation15_spill] sm:$0xff] }
 0x5a2   :  { %v1969_v62 = vpop.xlane.xlu1 %1968  ;;  %v2218_v31 = vsel %vm1814_vm0, %v2895_v5, 0.0  ;;  %v1745_v57 = vadd.f32 %v4669_v33, %v3936_v46  ;;  %v1808_v5 = vmax.f32 %v1741_v25, 0.0 }
 0x5a3   :  { %4665 = vst [vmem:[#allocation7_spill] sm:$0xff] %v4246_v48  ;;  %4666 = vst [vmem:[#allocation12_spill] sm:$0xff] %v4248_v49  ;;  %v2152_v47 = vmul.f32 1.442695, %v4246_v48  ;;  %v4257_v42 = vsub.f32 %v4668_v35, %v1969_v62  ;;  %v4259_v27 = vsub.f32 %v1806_v52, %v1969_v62  ;;  %2308 = vadd.xlane.f32.xlu1 %v2218_v31  ;;  %v4670_v35 = vld [vmem:[#allocation13_spill] sm:$0xff] }
 0x5a4   :  { %v1810_v63 = vmax.f32 %v1745_v57, 0.0  ;;  %v4671_v48 = vmax.f32 %v4670_v35, 0.0 }
 0x5a5   :  { %2900 = vpow2.f32 %v2152_v47  ;;  %v2156_v17 = vmul.f32 1.442695, %v4257_v42  ;;  %v4672_v47 = vld [vmem:[#allocation14_spill] sm:$0xff] }
 0x5a6   :  { %v4673_v33 = vmax.f32 %v4672_v47, 0.0 }
 0x5a7   :  { %v2897_v60 = vpop.eup %2896  ;;  %2902 = vpow2.f32 %v2156_v17 }
 0x5a8   :  { %v1972_v30 = vpop.xlane.xlu0 %1971  ;;  %v2220_v9 = vsel %vm1814_vm0, %v2897_v60, 0.0 }
 0x5a9   :  { %v2899_v49 = vpop.eup %2898  ;;  %v4268_v52 = vsub.f32 %v4671_v48, %v1972_v30  ;;  %v4270_v62 = vsub.f32 %v1808_v5, %v1972_v30  ;;  %2311 = vadd.xlane.f32.xlu0 %v2220_v9 }
 0x5aa   :  { %v1975_v46 = vpop.xlane.xlu1 %1974  ;;  %v2222_v31 = vsel %vm1814_vm0, %v2899_v49, 0.0 }
 0x5ab   :  { %v2160_v25 = vmul.f32 1.442695, %v4268_v52  ;;  %v4277_v17 = vsub.f32 %v4673_v33, %v1975_v46  ;;  %v4279_v60 = vsub.f32 %v1810_v63, %v1975_v46  ;;  %2314 = vadd.xlane.f32.xlu1 %v2222_v31 }
 0x5ad   :  { %2904 = vpow2.f32 %v2160_v25  ;;  %v2164_v48 = vmul.f32 1.442695, %v4277_v17 }
 0x5af   :  { %v2901_v57 = vpop.eup %2900  ;;  %2906 = vpow2.f32 %v2164_v48 }
 0x5b0   :  { %v2224_v5 = vsel %vm1814_vm0, %v2901_v57, 0.0 }
 0x5b1   :  { %v2903_v30 = vpop.eup %2902  ;;  %2317 = vadd.xlane.f32.xlu0 %v2224_v5 }
 0x5b2   :  { %v2226_v49 = vsel %vm1814_vm0, %v2903_v30, 0.0 }
 0x5b3   :  { %2320 = vadd.xlane.f32.xlu1 %v2226_v49 }
 0x5b7   :  { %v2905_v9 = vpop.eup %2904 }
 0x5b8   :  { %v2228_v63 = vsel %vm1814_vm0, %v2905_v9, 0.0 }
 0x5b9   :  { %v2907_v35 = vpop.eup %2906  ;;  %2323 = vadd.xlane.f32.xlu0 %v2228_v63 }
 0x5ba   :  { %v2230_v46 = vsel %vm1814_vm0, %v2907_v35, 0.0 }
 0x5bb   :  { %2326 = vadd.xlane.f32.xlu1 %v2230_v46 }
 0x5ce   :  { %v2234_v31 = vpop.xlane.xlu0 %2233 }
 0x5cf   :  { %2908 = vlog2.f32 %v2234_v31 }
 0x5d2   :  { %v2237_v25 = vpop.xlane.xlu1 %2236 }
 0x5d3   :  { %2910 = vlog2.f32 %v2237_v25  ;;  %v4674_v25 = vld [vmem:[#allocation16_spill] sm:$0xff] }
 0x5d6   :  { %v2240_v47 = vpop.xlane.xlu0 %2239 }
 0x5d7   :  { %2912 = vlog2.f32 %v2240_v47 }
 0x5d9   :  { %v2909_v33 = vpop.eup %2908 }
 0x5da   :  { %v2329_v48 = vmul.f32 0.6931472, %v2909_v33  ;;  %v2243_v57 = vpop.xlane.xlu1 %2242 }
 0x5db   :  { %2914 = vlog2.f32 %v2243_v57  ;;  %v4675_v57 = vld [vmem:[#allocation17_spill] sm:$0xff] }
 0x5dc   :  { %v2392_v5 = vsub.f32 %v3944_v38, %v2329_v48  ;;  %v2393_v30 = vsub.f32 %v3946_v21, %v2329_v48 }
 0x5dd   :  { %v2911_v49 = vpop.eup %2910 }
 0x5de   :  { %2456 = vst [vmem:[%s4552_s6] sm:$0xff] %v2392_v5  ;;  %2457 = vst [vmem:[%s4552_s6 + $0x8] sm:$0xff] %v2393_v30  ;;  %v2331_v50 = vmul.f32 0.6931472, %v2911_v49  ;;  %v2246_v9 = vpop.xlane.xlu0 %2245 }
 0x5df   :  { %2916 = vlog2.f32 %v2246_v9 }
 0x5e0   :  { %v2394_v63 = vsub.f32 %v3953_v4, %v2331_v50  ;;  %v2395_v35 = vsub.f32 %v3955_v7, %v2331_v50  ;;  %v2249_v46 = vpop.xlane.xlu1 %2248 }
 0x5e1   :  { %v2913_v38 = vpop.eup %2912  ;;  %2918 = vlog2.f32 %v2249_v46 }
 0x5e2   :  { %2458 = vst [vmem:[%s4552_s6 + $0x10] sm:$0xff] %v2394_v63  ;;  %2459 = vst [vmem:[%s4552_s6 + $0x18] sm:$0xff] %v2395_v35  ;;  %v2333_v21 = vmul.f32 0.6931472, %v2913_v38 }
 0x5e4   :  { %v2396_v31 = vsub.f32 %v3962_v18, %v2333_v21  ;;  %v2397_v47 = vsub.f32 %v4674_v25, %v2333_v21 }
 0x5e5   :  { %v2915_v33 = vpop.eup %2914 }
 0x5e6   :  { %2460 = vst [vmem:[%s4552_s6 + $0x20] sm:$0xff] %v2396_v31  ;;  %2461 = vst [vmem:[%s4552_s6 + $0x28] sm:$0xff] %v2397_v47  ;;  %v2335_v4 = vmul.f32 0.6931472, %v2915_v33  ;;  %v2252_v7 = vpop.xlane.xlu0 %2251 }
 0x5e7   :  { %2920 = vlog2.f32 %v2252_v7 }
 0x5e8   :  { %v2398_v48 = vsub.f32 %v3973_v58, %v2335_v4  ;;  %v2399_v5 = vsub.f32 %v4675_v57, %v2335_v4  ;;  %v2255_v30 = vpop.xlane.xlu1 %2254 }
 0x5e9   :  { %v2917_v18 = vpop.eup %2916  ;;  %2922 = vlog2.f32 %v2255_v30 }
 0x5ea   :  { %2462 = vst [vmem:[%s4552_s6 + $0x30] sm:$0xff] %v2398_v48  ;;  %2463 = vst [vmem:[%s4552_s6 + $0x38] sm:$0xff] %v2399_v5  ;;  %v2337_v49 = vmul.f32 0.6931472, %v2917_v18 }
 0x5eb   :  { %v2919_v50 = vpop.eup %2918 }
 0x5ec   :  { %v2400_v9 = vsub.f32 %v3982_v32, %v2337_v49  ;;  %v2401_v63 = vsub.f32 %v3984_v10, %v2337_v49  ;;  %v2339_v58 = vmul.f32 0.6931472, %v2919_v50 }
 0x5ee   :  { %2464 = vst [vmem:[%s4552_s6 + $0x40] sm:$0xff] %v2400_v9  ;;  %2465 = vst [vmem:[%s4552_s6 + $0x48] sm:$0xff] %v2401_v63  ;;  %v2402_v35 = vsub.f32 %v3991_v14, %v2339_v58  ;;  %v2403_v46 = vsub.f32 %v3993_v20, %v2339_v58  ;;  %v2258_v38 = vpop.xlane.xlu0 %2257 }
 0x5ef   :  { %2924 = vlog2.f32 %v2258_v38 }
 0x5f0   :  { %2466 = vst [vmem:[%s4552_s6 + $0x50] sm:$0xff] %v2402_v35  ;;  %2467 = vst [vmem:[%s4552_s6 + $0x58] sm:$0xff] %v2403_v46  ;;  %v2261_v32 = vpop.xlane.xlu1 %2260 }
 0x5f1   :  { %v2921_v10 = vpop.eup %2920  ;;  %2926 = vlog2.f32 %v2261_v32 }
 0x5f2   :  { %v2341_v21 = vmul.f32 0.6931472, %v2921_v10 }
 0x5f3   :  { %v2923_v31 = vpop.eup %2922 }
 0x5f4   :  { %v2404_v25 = vsub.f32 %v4004_v16, %v2341_v21  ;;  %v2405_v14 = vsub.f32 %v4006_v19, %v2341_v21  ;;  %v2343_v20 = vmul.f32 0.6931472, %v2923_v31 }
 0x5f6   :  { %2468 = vst [vmem:[%s4552_s6 + $0x60] sm:$0xff] %v2404_v25  ;;  %2469 = vst [vmem:[%s4552_s6 + $0x68] sm:$0xff] %v2405_v14  ;;  %v2406_v47 = vsub.f32 %v4013_v24, %v2343_v20  ;;  %v2407_v33 = vsub.f32 %v4015_v0, %v2343_v20  ;;  %v2264_v4 = vpop.xlane.xlu0 %2263 }
 0x5f7   :  { %2928 = vlog2.f32 %v2264_v4 }
 0x5f8   :  { %2470 = vst [vmem:[%s4552_s6 + $0x70] sm:$0xff] %v2406_v47  ;;  %2471 = vst [vmem:[%s4552_s6 + $0x78] sm:$0xff] %v2407_v33  ;;  %v2267_v16 = vpop.xlane.xlu1 %2266 }
 0x5f9   :  { %v2925_v19 = vpop.eup %2924  ;;  %2930 = vlog2.f32 %v2267_v16 }
 0x5fa   :  { %v2345_v7 = vmul.f32 0.6931472, %v2925_v19 }
 0x5fb   :  { %v2927_v48 = vpop.eup %2926 }
 0x5fc   :  { %v2408_v57 = vsub.f32 %v4026_v8, %v2345_v7  ;;  %v2409_v24 = vsub.f32 %v4028_v44, %v2345_v7  ;;  %v2347_v0 = vmul.f32 0.6931472, %v2927_v48 }
 0x5fe   :  { %2472 = vst [vmem:[%s4552_s6 + $0x80] sm:$0xff] %v2408_v57  ;;  %2473 = vst [vmem:[%s4552_s6 + $0x88] sm:$0xff] %v2409_v24  ;;  %v2410_v5 = vsub.f32 %v4037_v51, %v2347_v0  ;;  %v2411_v30 = vsub.f32 %v4039_v36, %v2347_v0  ;;  %v2270_v18 = vpop.xlane.xlu0 %2269 }
 0x5ff   :  { %2932 = vlog2.f32 %v2270_v18 }
 0x600   :  { %2474 = vst [vmem:[%s4552_s6 + $0x90] sm:$0xff] %v2410_v5  ;;  %2475 = vst [vmem:[%s4552_s6 + $0x98] sm:$0xff] %v2411_v30  ;;  %v2273_v8 = vpop.xlane.xlu1 %2272 }
 0x601   :  { %v2929_v44 = vpop.eup %2928  ;;  %2934 = vlog2.f32 %v2273_v8 }
 0x602   :  { %v2349_v49 = vmul.f32 0.6931472, %v2929_v44 }
 0x603   :  { %v2931_v50 = vpop.eup %2930 }
 0x604   :  { %v2412_v9 = vsub.f32 %v4048_v11, %v2349_v49  ;;  %v2413_v51 = vsub.f32 %v4050_v45, %v2349_v49  ;;  %v2351_v36 = vmul.f32 0.6931472, %v2931_v50 }
 0x606   :  { %2476 = vst [vmem:[%s4552_s6 + $0xa0] sm:$0xff] %v2412_v9  ;;  %2477 = vst [vmem:[%s4552_s6 + $0xa8] sm:$0xff] %v2413_v51  ;;  %v2414_v63 = vsub.f32 %v4059_v2, %v2351_v36  ;;  %v2415_v58 = vsub.f32 %v4061_v37, %v2351_v36  ;;  %v2276_v35 = vpop.xlane.xlu0 %2275 }
 0x607   :  { %2936 = vlog2.f32 %v2276_v35 }
 0x608   :  { %2478 = vst [vmem:[%s4552_s6 + $0xb0] sm:$0xff] %v2414_v63  ;;  %2479 = vst [vmem:[%s4552_s6 + $0xb8] sm:$0xff] %v2415_v58  ;;  %v2279_v11 = vpop.xlane.xlu1 %2278 }
 0x609   :  { %v2933_v45 = vpop.eup %2932  ;;  %2938 = vlog2.f32 %v2279_v11 }
 0x60a   :  { %v2353_v46 = vmul.f32 0.6931472, %v2933_v45 }
 0x60b   :  { %v2935_v38 = vpop.eup %2934 }
 0x60c   :  { %v2416_v32 = vsub.f32 %v4070_v43, %v2353_v46  ;;  %v2417_v2 = vsub.f32 %v4072_v39, %v2353_v46  ;;  %v2355_v37 = vmul.f32 0.6931472, %v2935_v38  ;;  %v4677_v46 = vld [vmem:[#allocation19_spill] sm:$0xff] }
 0x60e   :  { %2480 = vst [vmem:[%s4552_s6 + $0xc0] sm:$0xff] %v2416_v32  ;;  %2481 = vst [vmem:[%s4552_s6 + $0xc8] sm:$0xff] %v2417_v2  ;;  %v2418_v10 = vsub.f32 %v4081_v1, %v2355_v37  ;;  %v2419_v21 = vsub.f32 %v4083_v53, %v2355_v37  ;;  %v2282_v31 = vpop.xlane.xlu0 %2281  ;;  %v4678_v32 = vld [vmem:[#allocation20_spill] sm:$0xff] }
 0x60f   :  { %2940 = vlog2.f32 %v2282_v31 }
 0x610   :  { %2482 = vst [vmem:[%s4552_s6 + $0xd0] sm:$0xff] %v2418_v10  ;;  %2483 = vst [vmem:[%s4552_s6 + $0xd8] sm:$0xff] %v2419_v21  ;;  %v2285_v43 = vpop.xlane.xlu1 %2284 }
 0x611   :  { %v2937_v39 = vpop.eup %2936  ;;  %2942 = vlog2.f32 %v2285_v43  ;;  %v4679_v43 = vld [vmem:[#allocation4_spill] sm:$0xff] }
 0x612   :  { %v2357_v25 = vmul.f32 0.6931472, %v2937_v39 }
 0x613   :  { %v2939_v14 = vpop.eup %2938 }
 0x614   :  { %v2420_v20 = vsub.f32 %v4092_v59, %v2357_v25  ;;  %v2421_v1 = vsub.f32 %v4094_v23, %v2357_v25  ;;  %v2359_v53 = vmul.f32 0.6931472, %v2939_v14  ;;  %v4680_v25 = vld [vmem:[#allocation2_spill] sm:$0xff] }
 0x616   :  { %2484 = vst [vmem:[%s4552_s6 + $0xe0] sm:$0xff] %v2420_v20  ;;  %2485 = vst [vmem:[%s4552_s6 + $0xe8] sm:$0xff] %v2421_v1  ;;  %v2422_v47 = vsub.f32 %v4103_v56, %v2359_v53  ;;  %v2423_v33 = vsub.f32 %v4105_v12, %v2359_v53  ;;  %v2288_v4 = vpop.xlane.xlu0 %2287  ;;  %v4681_v1 = vld [vmem:[#allocation6_spill] sm:$0xff] }
 0x617   :  { %2944 = vlog2.f32 %v2288_v4 }
 0x618   :  { %2486 = vst [vmem:[%s4552_s6 + $0xf0] sm:$0xff] %v2422_v47  ;;  %2487 = vst [vmem:[%s4552_s6 + $0xf8] sm:$0xff] %v2423_v33  ;;  %v2291_v59 = vpop.xlane.xlu1 %2290  ;;  %v4682_v47 = vld [vmem:[#allocation3_spill] sm:$0xff] }
 0x619   :  { %v2941_v23 = vpop.eup %2940  ;;  %2946 = vlog2.f32 %v2291_v59 }
 0x61a   :  { %v2361_v16 = vmul.f32 0.6931472, %v2941_v23 }
 0x61b   :  { %v2943_v19 = vpop.eup %2942 }
 0x61c   :  { %v2424_v7 = vsub.f32 %v4114_v22, %v2361_v16  ;;  %v2425_v56 = vsub.f32 %v4116_v41, %v2361_v16  ;;  %v2363_v12 = vmul.f32 0.6931472, %v2943_v19 }
 0x61e   :  { %2488 = vst [vmem:[%s4552_s6 + $0x100] sm:$0xff] %v2424_v7  ;;  %2489 = vst [vmem:[%s4552_s6 + $0x108] sm:$0xff] %v2425_v56  ;;  %v2426_v48 = vsub.f32 %v4125_v6, %v2363_v12  ;;  %v2427_v57 = vsub.f32 %v4127_v40, %v2363_v12  ;;  %v2294_v24 = vpop.xlane.xlu0 %2293  ;;  %v4683_v7 = vld [vmem:[#allocation8_spill] sm:$0xff]  ;;  %v4684_v12 = vld [vmem:[#allocation5_spill] sm:$0xff] }
 0x61f   :  { %2948 = vlog2.f32 %v2294_v24 }
 0x620   :  { %2490 = vst [vmem:[%s4552_s6 + $0x110] sm:$0xff] %v2426_v48  ;;  %2491 = vst [vmem:[%s4552_s6 + $0x118] sm:$0xff] %v2427_v57  ;;  %v2297_v22 = vpop.xlane.xlu1 %2296 }
 0x621   :  { %v2945_v41 = vpop.eup %2944  ;;  %2950 = vlog2.f32 %v2297_v22  ;;  %v4685_v22 = vld [vmem:[#allocation10_spill] sm:$0xff] }
 0x622   :  { %v2365_v0 = vmul.f32 0.6931472, %v2945_v41 }
 0x623   :  { %v2947_v5 = vpop.eup %2946 }
 0x624   :  { %v2428_v30 = vsub.f32 %v4136_v26, %v2365_v0  ;;  %v2429_v6 = vsub.f32 %v4138_v34, %v2365_v0  ;;  %v2367_v40 = vmul.f32 0.6931472, %v2947_v5 }
 0x626   :  { %2492 = vst [vmem:[%s4552_s6 + $0x120] sm:$0xff] %v2428_v30  ;;  %2493 = vst [vmem:[%s4552_s6 + $0x128] sm:$0xff] %v2429_v6  ;;  %v2430_v18 = vsub.f32 %v4147_v54, %v2367_v40  ;;  %v2431_v8 = vsub.f32 %v4149_v61, %v2367_v40  ;;  %v2300_v44 = vpop.xlane.xlu0 %2299 }
 0x627   :  { %2952 = vlog2.f32 %v2300_v44 }
 0x628   :  { %2494 = vst [vmem:[%s4552_s6 + $0x130] sm:$0xff] %v2430_v18  ;;  %2495 = vst [vmem:[%s4552_s6 + $0x138] sm:$0xff] %v2431_v8  ;;  %v2303_v26 = vpop.xlane.xlu1 %2302  ;;  %v4686_v18 = vld [vmem:[#allocation7_spill] sm:$0xff] }
 0x629   :  { %v2949_v34 = vpop.eup %2948  ;;  %2954 = vlog2.f32 %v2303_v26 }
 0x62a   :  { %v2369_v49 = vmul.f32 0.6931472, %v2949_v34 }
 0x62b   :  { %v2951_v50 = vpop.eup %2950 }
 0x62c   :  { %v2432_v9 = vsub.f32 %v4158_v29, %v2369_v49  ;;  %v2433_v54 = vsub.f32 %v4160_v15, %v2369_v49  ;;  %v2371_v61 = vmul.f32 0.6931472, %v2951_v50 }
 0x62e   :  { %2496 = vst [vmem:[%s4552_s6 + $0x140] sm:$0xff] %v2432_v9  ;;  %2497 = vst [vmem:[%s4552_s6 + $0x148] sm:$0xff] %v2433_v54  ;;  %v2434_v51 = vsub.f32 %v4169_v13, %v2371_v61  ;;  %v2435_v36 = vsub.f32 %v4171_v55, %v2371_v61  ;;  %v2306_v63 = vpop.xlane.xlu0 %2305  ;;  %v4676_v13 = vld [vmem:[#allocation18_spill] sm:$0xff] }
 0x62f   :  { %2956 = vlog2.f32 %v2306_v63 }
 0x630   :  { %2498 = vst [vmem:[%s4552_s6 + $0x150] sm:$0xff] %v2434_v51  ;;  %2499 = vst [vmem:[%s4552_s6 + $0x158] sm:$0xff] %v2435_v36  ;;  %v2309_v29 = vpop.xlane.xlu1 %2308 }
 0x631   :  { %v2953_v15 = vpop.eup %2952  ;;  %2958 = vlog2.f32 %v2309_v29 }
 0x632   :  { %v2373_v58 = vmul.f32 0.6931472, %v2953_v15 }
 0x633   :  { %v2955_v35 = vpop.eup %2954 }
 0x634   :  { %v2436_v11 = vsub.f32 %v4180_v28, %v2373_v58  ;;  %v2437_v45 = vsub.f32 %v4676_v13, %v2373_v58  ;;  %v2375_v55 = vmul.f32 0.6931472, %v2955_v35 }
 0x636   :  { %2500 = vst [vmem:[%s4552_s6 + $0x160] sm:$0xff] %v2436_v11  ;;  %2501 = vst [vmem:[%s4552_s6 + $0x168] sm:$0xff] %v2437_v45  ;;  %v2438_v38 = vsub.f32 %v4677_v46, %v2375_v55  ;;  %v2439_v2 = vsub.f32 %v4678_v32, %v2375_v55  ;;  %v2312_v37 = vpop.xlane.xlu0 %2311 }
 0x637   :  { %2960 = vlog2.f32 %v2312_v37 }
 0x638   :  { %2502 = vst [vmem:[%s4552_s6 + $0x170] sm:$0xff] %v2438_v38  ;;  %2503 = vst [vmem:[%s4552_s6 + $0x178] sm:$0xff] %v2439_v2  ;;  %v2315_v28 = vpop.xlane.xlu1 %2314 }
 0x639   :  { %v2957_v10 = vpop.eup %2956  ;;  %2962 = vlog2.f32 %v2315_v28 }
 0x63a   :  { %v2377_v21 = vmul.f32 0.6931472, %v2957_v10 }
 0x63b   :  { %v2959_v31 = vpop.eup %2958 }
 0x63c   :  { %v2440_v39 = vsub.f32 %v4679_v43, %v2377_v21  ;;  %v2441_v14 = vsub.f32 %v4680_v25, %v2377_v21  ;;  %v2379_v20 = vmul.f32 0.6931472, %v2959_v31 }
 0x63e   :  { %2504 = vst [vmem:[%s4552_s6 + $0x180] sm:$0xff] %v2440_v39  ;;  %2505 = vst [vmem:[%s4552_s6 + $0x188] sm:$0xff] %v2441_v14  ;;  %v2442_v53 = vsub.f32 %v4681_v1, %v2379_v20  ;;  %v2443_v33 = vsub.f32 %v4682_v47, %v2379_v20  ;;  %v2318_v4 = vpop.xlane.xlu0 %2317 }
 0x63f   :  { %2964 = vlog2.f32 %v2318_v4 }
 0x640   :  { %2506 = vst [vmem:[%s4552_s6 + $0x190] sm:$0xff] %v2442_v53  ;;  %2507 = vst [vmem:[%s4552_s6 + $0x198] sm:$0xff] %v2443_v33  ;;  %v2321_v59 = vpop.xlane.xlu1 %2320 }
 0x641   :  { %v2961_v23 = vpop.eup %2960  ;;  %2966 = vlog2.f32 %v2321_v59 }
 0x642   :  { %v2381_v16 = vmul.f32 0.6931472, %v2961_v23 }
 0x643   :  { %v2963_v19 = vpop.eup %2962 }
 0x644   :  { %v2444_v56 = vsub.f32 %v4683_v7, %v2381_v16  ;;  %v2445_v48 = vsub.f32 %v4684_v12, %v2381_v16  ;;  %v2383_v57 = vmul.f32 0.6931472, %v2963_v19 }
 0x646   :  { %2508 = vst [vmem:[%s4552_s6 + $0x1a0] sm:$0xff] %v2444_v56  ;;  %2509 = vst [vmem:[%s4552_s6 + $0x1a8] sm:$0xff] %v2445_v48  ;;  %v2446_v24 = vsub.f32 %v4235_v3, %v2383_v57  ;;  %v2447_v41 = vsub.f32 %v4685_v22, %v2383_v57  ;;  %v2324_v0 = vpop.xlane.xlu0 %2323  ;;  %v4687_v3 = vld [vmem:[#allocation12_spill] sm:$0xff] }
 0x647   :  { %2968 = vlog2.f32 %v2324_v0 }
 0x648   :  { %2510 = vst [vmem:[%s4552_s6 + $0x1b0] sm:$0xff] %v2446_v24  ;;  %2511 = vst [vmem:[%s4552_s6 + $0x1b8] sm:$0xff] %v2447_v41  ;;  %v2327_v5 = vpop.xlane.xlu1 %2326 }
 0x649   :  { %v2965_v30 = vpop.eup %2964  ;;  %2970 = vlog2.f32 %v2327_v5 }
 0x64a   :  { %v2385_v6 = vmul.f32 0.6931472, %v2965_v30 }
 0x64b   :  { %v2967_v40 = vpop.eup %2966 }
 0x64c   :  { %v2448_v8 = vsub.f32 %v4686_v18, %v2385_v6  ;;  %v2449_v44 = vsub.f32 %v4687_v3, %v2385_v6  ;;  %v2387_v26 = vmul.f32 0.6931472, %v2967_v40 }
 0x64e   :  { %2512 = vst [vmem:[%s4552_s6 + $0x1c0] sm:$0xff] %v2448_v8  ;;  %2513 = vst [vmem:[%s4552_s6 + $0x1c8] sm:$0xff] %v2449_v44  ;;  %v2450_v34 = vsub.f32 %v4257_v42, %v2387_v26  ;;  %v2451_v49 = vsub.f32 %v4259_v27, %v2387_v26 }
 0x650   :  { %2514 = vst [vmem:[%s4552_s6 + $0x1d0] sm:$0xff] %v2450_v34  ;;  %2515 = vst [vmem:[%s4552_s6 + $0x1d8] sm:$0xff] %v2451_v49 }
 0x651   :  { %v2969_v50 = vpop.eup %2968 }
 0x652   :  { %v2389_v9 = vmul.f32 0.6931472, %v2969_v50 }
 0x653   :  { %v2971_v54 = vpop.eup %2970 }
 0x654   :  { %v2452_v61 = vsub.f32 %v4268_v52, %v2389_v9  ;;  %v2453_v51 = vsub.f32 %v4270_v62, %v2389_v9  ;;  %v2391_v36 = vmul.f32 0.6931472, %v2971_v54 }
 0x656   :  { %2516 = vst [vmem:[%s4552_s6 + $0x1e0] sm:$0xff] %v2452_v61  ;;  %2517 = vst [vmem:[%s4552_s6 + $0x1e8] sm:$0xff] %v2453_v51  ;;  %v2454_v42 = vsub.f32 %v4277_v17, %v2391_v36  ;;  %v2455_v27 = vsub.f32 %v4279_v60, %v2391_v36 }
 0x658   :  { %2518 = vst [vmem:[%s4552_s6 + $0x1f0] sm:$0xff] %v2454_v42  ;;  %2519 = vst [vmem:[%s4552_s6 + $0x1f8] sm:$0xff] %v2455_v27 }

</bundles_post_ra>
